<compile_context>
chip_gen: v7x
topology: tpu7x:2x2x1
jax: 0.10.0
libtpu: 0.0.40
codegen_flags: <defaults>
</compile_context>

<pallas_src>
import functools

import numpy as np
import jax
import jax.numpy as jnp
from jax import lax
from jax.experimental import pallas as pl
from jax.experimental.pallas import tpu as pltpu


# ----------------------------------------------------------------------------
# Fused kernel: one block of G images, lane-packed to N = G*HW for the convs
# ----------------------------------------------------------------------------
def make_egf_kernel(H, W, G, C, P):
    HW = H * W
    N = G * HW
    # tap order t = 3*(dy+1) + (dx+1), matching the host-side weight packing
    tap_shifts = [(-(dy * W + dx)) % N for dy in (-1, 0, 1) for dx in (-1, 0, 1)]
    CENTER = 4  # dy = dx = 0 -> no roll, no boundary clipping

    def kernel(x_ref, d_ref, tapmask_ref, gatew_ref, gateln_ref,
               convw_ref, convab_ref, out_ref, feae_ref):
        x = x_ref[...]            # (G, C, HW) f32
        d = d_ref[...]            # (G, C, HW) f32

        # ---------------- gating (VPU/XLU + EUP only), batched over G --------
        gw = gatew_ref[...]       # (C, 2*(1+2P)) : [wm_e|w1t_e|w2_e|wm_r|w1t_r|w2_r]
        gl = gateln_ref[...]      # (4, P)        : [g_e; b_e; g_r; b_r]

        def gate_params(branch):
            o = branch * (1 + 2 * P)
            wm  = gw[:, o:o + 1]                      # (C, 1)
            w1t = gw[:, o + 1:o + 1 + P]              # (C, P)
            w2  = gw[:, o + 1 + P:o + 1 + 2 * P]      # (C, P)
            ln_g = gl[2 * branch:2 * branch + 1]      # (1, P)
            ln_b = gl[2 * branch + 1:2 * branch + 2]  # (1, P)
            return wm, w1t, w2, ln_g, ln_b

        def channel_mul_term(feat, wm, w1t, w2, ln_g, ln_b):
            # spatial_pool: 1x1 mask conv (sublane reduce) + softmax + context
            logits = jnp.sum(feat * wm, axis=1, keepdims=True)           # (G,1,HW)
            m = jnp.max(logits, axis=-1, keepdims=True)
            e = jnp.exp(logits - m)
            inv = pl.reciprocal(jnp.sum(e, axis=-1, keepdims=True), approx=True)
            probs = e * inv                                              # (G,1,HW)
            ctx = jnp.sum(feat * probs, axis=-1, keepdims=True)          # (G,C,1)
            # channel_mul_conv: 1x1 -> LayerNorm([P,1,1]) -> ReLU -> 1x1
            h = jnp.sum(w1t * ctx, axis=1, keepdims=True)                # (G,1,P)
            mu = jnp.mean(h, axis=-1, keepdims=True)
            var = jnp.mean((h - mu) ** 2, axis=-1, keepdims=True)
            hn = (h - mu) * lax.rsqrt(var + 1e-5) * ln_g + ln_b
            hn = jnp.maximum(hn, 0.0)
            t = jnp.sum(w2 * hn, axis=-1, keepdims=True)                 # (G,C,1)
            return jax.nn.sigmoid(t)

        # Event branch gates RGB
        term_e = channel_mul_term(d, *gate_params(0))
        fea_e = d * term_e                                               # (G,C,HW)
        f_out = x * jax.nn.sigmoid(fea_e) + x
        # RGB branch gates Event
        term_r = channel_mul_term(x, *gate_params(1))
        e_out = d * jax.nn.sigmoid(x * term_r) + d
        feae_ref[...] = fea_e

        # ---------------- 3x3 convs: lane-pack batch, sublane-stack pairs ----
        masks = tapmask_ref[...]                                         # (9, N) f32

        def lane_pack(t3):                 # (G, C, HW) -> (C, G*HW), no lane shuffle
            if G == 1:
                return t3[0]
            return jnp.concatenate([t3[g] for g in range(G)], axis=-1)

        def im2col(stacked):               # (2C, N) f32 -> (18C, N) bf16
            blocks = []
            for t, shift in enumerate(tap_shifts):
                r = stacked if shift == 0 else pltpu.roll(stacked, shift=shift, axis=1)
                if t != CENTER:
                    r = r * masks[t:t + 1]           # zero-pad mask (also kills
                blocks.append(r.astype(jnp.bfloat16))  # cross-image wrap-around)
            return jnp.concatenate(blocks, axis=0)

        wc = convw_ref[...]                # (3C, 18C) bf16 : [block-diag rgb/evt ; out]
        ab = convab_ref[...]               # (3C, 2)  f32   : folded (bias+BN) affine

        def conv_affine_relu(patches, w, a, b):
            acc = jnp.dot(w, patches, preferred_element_type=jnp.float32)
            return jnp.maximum(acc * a + b, 0.0)

        # conv1_rgb + conv1_evt in ONE matmul via a block-diagonal weight
        stacked1 = jnp.concatenate([lane_pack(f_out), lane_pack(e_out)], axis=0)  # (2C,N)
        y12 = conv_affine_relu(im2col(stacked1), wc[:2 * C],
                               ab[:2 * C, 0:1], ab[:2 * C, 1:2])                  # (2C,N)
        rgb2 = y12[:C]
        evt2 = y12[C:]

        # conv_out on the sublane-stacked max||mean (its im2col IS the 18C block)
        stacked2 = jnp.concatenate([jnp.maximum(rgb2, evt2),
                                    (rgb2 + evt2) * 0.5], axis=0)                 # (2C,N)
        y3 = conv_affine_relu(im2col(stacked2), wc[2 * C:],
                              ab[2 * C:, 0:1], ab[2 * C:, 1:2])                   # (C,N)

        # scatter back to the NCHW-derived (G, C, HW) layout (lane-dense stores)
        for g in range(G):
            out_ref[g] = y3[:, g * HW:(g + 1) * HW]

    return kernel


def run_egf(x, d, tap_masks, params, H, W, G):
    # x, d: (B, C, HW) f32
    B, C, HW = x.shape
    P = params["gate_ln"].shape[1]
    num_blocks = B // G
    img_spec = pl.BlockSpec((G, C, HW), lambda i: (i, 0, 0))

    def const_spec(arr):
        zeros = (0,) * arr.ndim
        return pl.BlockSpec(arr.shape, lambda i, _z=zeros: _z)

    consts = [tap_masks, params["gate_w"], params["gate_ln"],
              params["conv_w"], params["conv_ab"]]
    kernel = make_egf_kernel(H, W, G, C, P)
    out_shape = (jax.ShapeDtypeStruct((B, C, HW), jnp.float32),   # out
                 jax.ShapeDtypeStruct((B, C, HW), jnp.float32))   # fea_e
    return pl.pallas_call(
        kernel,
        out_shape=out_shape,
        grid=(num_blocks,),
        in_specs=[img_spec, img_spec] + [const_spec(a) for a in consts],
        out_specs=(img_spec, img_spec),
        compiler_params=pltpu.CompilerParams(
            dimension_semantics=("parallel",),
            vmem_limit_bytes=32 * 1024 * 1024),
    )(x, d, *consts)


# ----------------------------------------------------------------------------
# Host wrapper (only free reshapes; layout stays NCHW-derived (.., C, HW))
# ----------------------------------------------------------------------------
def build_tap_masks(H, W, G):
    # (9, G*HW) f32; mask[t] zeros out-of-image taps (conv zero padding) and,
    # because it is tiled per image, also any roll wrap-around between images.
    hh, ww = np.meshgrid(np.arange(H), np.arange(W), indexing="ij")
    hh = hh.reshape(-1)
    ww = ww.reshape(-1)
    m = np.zeros((9, H * W), np.float32)
    t = 0
    for dy in (-1, 0, 1):
        for dx in (-1, 0, 1):
            valid = ((hh + dy >= 0) & (hh + dy < H) &
                     (ww + dx >= 0) & (ww + dx < W))
            m[t] = valid.astype(np.float32)
            t += 1
    return jnp.asarray(np.tile(m, (1, G)))


def egf_forward(x_nchw, depth_nchw, params, num_blocks=1):
    # num_blocks=1: fold the whole batch (best on v5e/v6e).
    # num_blocks=2: one block per TensorCore on v7x (grid axis is "parallel").
    B, C, H, W = x_nchw.shape
    assert B % num_blocks == 0
    G = B // num_blocks
    HW = H * W
    x = x_nchw.reshape(B, C, HW).astype(jnp.float32)
    d = depth_nchw.reshape(B, C, HW).astype(jnp.float32)
    tap_masks = build_tap_masks(H, W, G)
    out, fea_e = run_egf(x, d, tap_masks, params, H, W, G)
    return out.reshape(B, C, H, W), fea_e.reshape(B, C, H, W)


# ----------------------------------------------------------------------------
# Parameters: deterministic random, packed into lane-dense slabs
# ----------------------------------------------------------------------------
def init_params(key, C, P, eps=1e-5):
    ks = jax.random.split(key, 12)

    def rnd(k, shape, s=0.1):
        return (s * jax.random.normal(k, shape)).astype(jnp.float32)

    # gating weights: conv_mask (1,C,1,1) -> wm (C,1); channel_mul_conv
    # w1 (P,C,1,1) -> w1t (C,P); w2 (C,P,1,1) -> (C,P).  Both branches.
    wm_e, w1t_e, w2_e = rnd(ks[0], (C, 1)), rnd(ks[1], (C, P)), rnd(ks[2], (C, P))
    wm_r, w1t_r, w2_r = rnd(ks[3], (C, 1)), rnd(ks[4], (C, P)), rnd(ks[5], (C, P))
    gate_w = jnp.concatenate([wm_e, w1t_e, w2_e, wm_r, w1t_r, w2_r], axis=1)  # (C, 2+4P)
    gate_ln = jnp.concatenate([jnp.ones((1, P)), jnp.zeros((1, P)),
                               jnp.ones((1, P)), jnp.zeros((1, P))],
                              axis=0).astype(jnp.float32)                     # (4, P)

    def pack3x3(w):
        # (Cout, Cin, 3, 3) -> (Cout, 9*Cin), tap-major t = 3*kh + kw
        cout, cin = w.shape[:2]
        return jnp.transpose(w, (0, 2, 3, 1)).reshape(cout, 9 * cin)

    w_rgb4 = rnd(ks[6], (C, C, 3, 3));      b_rgb = rnd(ks[7], (C,), 0.01)
    w_evt4 = rnd(ks[8], (C, C, 3, 3));      b_evt = rnd(ks[9], (C,), 0.01)
    w_out4 = rnd(ks[10], (C, 2 * C, 3, 3)); b_out = rnd(ks[11], (C,), 0.01)   # in: max||mean

    # block-diagonal merged weight: stacked input is [f_out ; e_out] along channels
    w_merged4 = jnp.zeros((2 * C, 2 * C, 3, 3), jnp.float32)
    w_merged4 = w_merged4.at[:C, :C].set(w_rgb4).at[C:, C:].set(w_evt4)
    conv_w = jnp.concatenate([pack3x3(w_merged4), pack3x3(w_out4)],
                             axis=0).astype(jnp.bfloat16)                     # (3C, 18C)

    # fold conv bias + eval-mode BN (gamma=1, beta=0, mean=0, var=1) into (a, b)
    a_val = np.float32(1.0 / np.sqrt(1.0 + eps))

    def ab(bias):
        a = jnp.full((C, 1), a_val, jnp.float32)
        return jnp.concatenate([a, bias.reshape(C, 1) * a], axis=1)           # (C, 2)

    conv_ab = jnp.concatenate([ab(b_rgb), ab(b_evt), ab(b_out)], axis=0)      # (3C, 2)

    return dict(gate_w=gate_w, gate_ln=gate_ln, conv_w=conv_w, conv_ab=conv_ab)


if __name__ == "__main__":
    B, C, P, H, W = 2, 8, 4, 16, 16   # inplanes=8, planes=4
    key = jax.random.PRNGKey(0)
    kx, kd, kp = jax.random.split(key, 3)
    x = jax.random.normal(kx, (B, C, H, W), jnp.float32)
    depth = jax.random.normal(kd, (B, C, H, W), jnp.float32)
    params = init_params(kp, C, P)

    fwd = jax.jit(functools.partial(egf_forward, params=params))
    out, fea_e = jax.block_until_ready(fwd(x, depth))

    assert out.shape == (B, C, H, W), out.shape
    assert fea_e.shape == (B, C, H, W), fea_e.shape
    assert bool(jnp.all(jnp.isfinite(out))) and bool(jnp.all(jnp.isfinite(fea_e)))
    print("KERNEL_OK")
</pallas_src>

<mosaic_0001>
module attributes {stable_mosaic.version = 11 : i64} {
  func.func @kernel(%arg0: i32, %arg1: memref<2x8x256xf32, #tpu.memory_space<vmem>>, %arg2: memref<2x8x256xf32, #tpu.memory_space<vmem>>, %arg3: memref<9x512xf32, #tpu.memory_space<vmem>>, %arg4: memref<8x18xf32, #tpu.memory_space<vmem>>, %arg5: memref<4x4xf32, #tpu.memory_space<vmem>>, %arg6: memref<24x144xbf16, #tpu.memory_space<vmem>>, %arg7: memref<24x2xf32, #tpu.memory_space<vmem>>, %arg8: memref<2x8x256xf32, #tpu.memory_space<vmem>>, %arg9: memref<2x8x256xf32, #tpu.memory_space<vmem>>) attributes {dimension_semantics = [#tpu.dimension_semantics<parallel>], iteration_bounds = array<i64: 1>, scalar_prefetch = 0 : i64, scratch_operands = 0 : i64, tpu.core_type = #tpu.core_type<tc>, window_params = [{transform_indices = @transform_0, window_bounds = array<i64: 2, 8, 256>}, {transform_indices = @transform_1, window_bounds = array<i64: 2, 8, 256>}, {pipeline_mode = #tpu.pipeline_mode<synchronous>, transform_indices = @transform_2, window_bounds = array<i64: 9, 512>}, {pipeline_mode = #tpu.pipeline_mode<synchronous>, transform_indices = @transform_3, window_bounds = array<i64: 8, 18>}, {pipeline_mode = #tpu.pipeline_mode<synchronous>, transform_indices = @transform_4, window_bounds = array<i64: 4, 4>}, {pipeline_mode = #tpu.pipeline_mode<synchronous>, transform_indices = @transform_5, window_bounds = array<i64: 24, 144>}, {pipeline_mode = #tpu.pipeline_mode<synchronous>, transform_indices = @transform_6, window_bounds = array<i64: 24, 2>}, {transform_indices = @transform_7, window_bounds = array<i64: 2, 8, 256>}, {transform_indices = @transform_8, window_bounds = array<i64: 2, 8, 256>}]} {
    %c0 = arith.constant 0 : index
    %c0_0 = arith.constant 0 : index
    %c0_1 = arith.constant 0 : index
    %0 = vector.load %arg1[%c0, %c0_0, %c0_1] : memref<2x8x256xf32, #tpu.memory_space<vmem>>, vector<2x8x256xf32>
    %c0_2 = arith.constant 0 : index
    %c0_3 = arith.constant 0 : index
    %c0_4 = arith.constant 0 : index
    %1 = vector.load %arg2[%c0_2, %c0_3, %c0_4] : memref<2x8x256xf32, #tpu.memory_space<vmem>>, vector<2x8x256xf32>
    %c0_5 = arith.constant 0 : index
    %c0_6 = arith.constant 0 : index
    %2 = vector.load %arg4[%c0_5, %c0_6] : memref<8x18xf32, #tpu.memory_space<vmem>>, vector<8x18xf32>
    %c0_7 = arith.constant 0 : index
    %c0_8 = arith.constant 0 : index
    %3 = vector.load %arg5[%c0_7, %c0_8] : memref<4x4xf32, #tpu.memory_space<vmem>>, vector<4x4xf32>
    %4 = vector.extract_strided_slice %2 {offsets = [0, 0], sizes = [8, 1], strides = [1, 1]} : vector<8x18xf32> to vector<8x1xf32>
    %5 = vector.extract_strided_slice %2 {offsets = [0, 1], sizes = [8, 4], strides = [1, 1]} : vector<8x18xf32> to vector<8x4xf32>
    %6 = vector.extract_strided_slice %2 {offsets = [0, 5], sizes = [8, 4], strides = [1, 1]} : vector<8x18xf32> to vector<8x4xf32>
    %7 = vector.extract_strided_slice %3 {offsets = [0, 0], sizes = [1, 4], strides = [1, 1]} : vector<4x4xf32> to vector<1x4xf32>
    %8 = vector.extract_strided_slice %3 {offsets = [1, 0], sizes = [1, 4], strides = [1, 1]} : vector<4x4xf32> to vector<1x4xf32>
    %9 = vector.shape_cast %4 : vector<8x1xf32> to vector<1x8x1xf32>
    %10 = vector.broadcast %9 : vector<1x8x1xf32> to vector<2x8x256xf32>
    %11 = arith.mulf %1, %10 : vector<2x8x256xf32>
    %cst = arith.constant dense<0.000000e+00> : vector<2x256xf32>
    %12 = vector.multi_reduction <add>, %11, %cst [1] : vector<2x8x256xf32> to vector<2x256xf32>
    %13 = vector.shape_cast %12 : vector<2x256xf32> to vector<2x1x256xf32>
    %cst_9 = arith.constant dense<0xFF800000> : vector<2x1xf32>
    %14 = vector.multi_reduction <maximumf>, %13, %cst_9 [2] : vector<2x1x256xf32> to vector<2x1xf32>
    %15 = vector.shape_cast %14 : vector<2x1xf32> to vector<2x1x1xf32>
    %16 = vector.broadcast %15 : vector<2x1x1xf32> to vector<2x1x256xf32>
    %17 = arith.subf %13, %16 : vector<2x1x256xf32>
    %18 = math.exp %17 : vector<2x1x256xf32>
    %cst_10 = arith.constant dense<0.000000e+00> : vector<2x1xf32>
    %19 = vector.multi_reduction <add>, %18, %cst_10 [2] : vector<2x1x256xf32> to vector<2x1xf32>
    %20 = vector.shape_cast %19 : vector<2x1xf32> to vector<2x1x1xf32>
    %21 = tpu.reciprocal %20 {approx = true} : vector<2x1x1xf32> -> vector<2x1x1xf32>
    %22 = vector.broadcast %21 : vector<2x1x1xf32> to vector<2x1x256xf32>
    %23 = arith.mulf %18, %22 : vector<2x1x256xf32>
    %24 = vector.broadcast %23 : vector<2x1x256xf32> to vector<2x8x256xf32>
    %25 = arith.mulf %1, %24 : vector<2x8x256xf32>
    %cst_11 = arith.constant dense<0.000000e+00> : vector<2x8xf32>
    %26 = vector.multi_reduction <add>, %25, %cst_11 [2] : vector<2x8x256xf32> to vector<2x8xf32>
    %27 = vector.shape_cast %26 : vector<2x8xf32> to vector<2x8x1xf32>
    %28 = vector.shape_cast %5 : vector<8x4xf32> to vector<1x8x4xf32>
    %29 = vector.broadcast %28 : vector<1x8x4xf32> to vector<2x8x4xf32>
    %30 = vector.broadcast %27 : vector<2x8x1xf32> to vector<2x8x4xf32>
    %31 = arith.mulf %29, %30 : vector<2x8x4xf32>
    %cst_12 = arith.constant dense<0.000000e+00> : vector<2x4xf32>
    %32 = vector.multi_reduction <add>, %31, %cst_12 [1] : vector<2x8x4xf32> to vector<2x4xf32>
    %33 = vector.shape_cast %32 : vector<2x4xf32> to vector<2x1x4xf32>
    %cst_13 = arith.constant dense<0.000000e+00> : vector<2x1xf32>
    %34 = vector.multi_reduction <add>, %33, %cst_13 [2] : vector<2x1x4xf32> to vector<2x1xf32>
    %35 = vector.shape_cast %34 : vector<2x1xf32> to vector<2x1x1xf32>
    %cst_14 = arith.constant 4.000000e+00 : f32
    %36 = vector.broadcast %cst_14 : f32 to vector<2x1x1xf32>
    %37 = arith.divf %35, %36 : vector<2x1x1xf32>
    %38 = vector.broadcast %37 : vector<2x1x1xf32> to vector<2x1x4xf32>
    %39 = arith.subf %33, %38 : vector<2x1x4xf32>
    %40 = arith.mulf %39, %39 : vector<2x1x4xf32>
    %cst_15 = arith.constant dense<0.000000e+00> : vector<2x1xf32>
    %41 = vector.multi_reduction <add>, %40, %cst_15 [2] : vector<2x1x4xf32> to vector<2x1xf32>
    %42 = vector.shape_cast %41 : vector<2x1xf32> to vector<2x1x1xf32>
    %cst_16 = arith.constant 4.000000e+00 : f32
    %43 = vector.broadcast %cst_16 : f32 to vector<2x1x1xf32>
    %44 = arith.divf %42, %43 : vector<2x1x1xf32>
    %45 = vector.broadcast %37 : vector<2x1x1xf32> to vector<2x1x4xf32>
    %46 = arith.subf %33, %45 : vector<2x1x4xf32>
    %cst_17 = arith.constant 9.99999974E-6 : f32
    %47 = vector.broadcast %cst_17 : f32 to vector<2x1x1xf32>
    %48 = arith.addf %44, %47 : vector<2x1x1xf32>
    %49 = math.rsqrt %48 : vector<2x1x1xf32>
    %50 = vector.broadcast %49 : vector<2x1x1xf32> to vector<2x1x4xf32>
    %51 = arith.mulf %46, %50 : vector<2x1x4xf32>
    %52 = vector.shape_cast %7 : vector<1x4xf32> to vector<1x1x4xf32>
    %53 = vector.broadcast %52 : vector<1x1x4xf32> to vector<2x1x4xf32>
    %54 = arith.mulf %51, %53 : vector<2x1x4xf32>
    %55 = vector.shape_cast %8 : vector<1x4xf32> to vector<1x1x4xf32>
    %56 = vector.broadcast %55 : vector<1x1x4xf32> to vector<2x1x4xf32>
    %57 = arith.addf %54, %56 : vector<2x1x4xf32>
    %cst_18 = arith.constant 0.000000e+00 : f32
    %58 = vector.broadcast %cst_18 : f32 to vector<2x1x4xf32>
    %59 = arith.maximumf %57, %58 : vector<2x1x4xf32>
    %60 = vector.shape_cast %6 : vector<8x4xf32> to vector<1x8x4xf32>
    %61 = vector.broadcast %60 : vector<1x8x4xf32> to vector<2x8x4xf32>
    %62 = vector.broadcast %59 : vector<2x1x4xf32> to vector<2x8x4xf32>
    %63 = arith.mulf %61, %62 : vector<2x8x4xf32>
    %cst_19 = arith.constant dense<0.000000e+00> : vector<2x8xf32>
    %64 = vector.multi_reduction <add>, %63, %cst_19 [2] : vector<2x8x4xf32> to vector<2x8xf32>
    %65 = vector.shape_cast %64 : vector<2x8xf32> to vector<2x8x1xf32>
    %66 = arith.negf %65 : vector<2x8x1xf32>
    %67 = math.exp %66 : vector<2x8x1xf32>
    %cst_20 = arith.constant 1.000000e+00 : f32
    %68 = vector.broadcast %cst_20 : f32 to vector<2x8x1xf32>
    %69 = arith.addf %68, %67 : vector<2x8x1xf32>
    %70 = arith.divf %68, %69 : vector<2x8x1xf32>
    %71 = vector.broadcast %70 : vector<2x8x1xf32> to vector<2x8x256xf32>
    %72 = arith.mulf %1, %71 : vector<2x8x256xf32>
    %73 = arith.negf %72 : vector<2x8x256xf32>
    %74 = math.exp %73 : vector<2x8x256xf32>
    %cst_21 = arith.constant 1.000000e+00 : f32
    %75 = vector.broadcast %cst_21 : f32 to vector<2x8x256xf32>
    %76 = arith.addf %75, %74 : vector<2x8x256xf32>
    %77 = arith.divf %75, %76 : vector<2x8x256xf32>
    %78 = arith.mulf %0, %77 : vector<2x8x256xf32>
    %79 = arith.addf %78, %0 : vector<2x8x256xf32>
    %80 = vector.extract_strided_slice %2 {offsets = [0, 9], sizes = [8, 1], strides = [1, 1]} : vector<8x18xf32> to vector<8x1xf32>
    %81 = vector.extract_strided_slice %2 {offsets = [0, 10], sizes = [8, 4], strides = [1, 1]} : vector<8x18xf32> to vector<8x4xf32>
    %82 = vector.extract_strided_slice %2 {offsets = [0, 14], sizes = [8, 4], strides = [1, 1]} : vector<8x18xf32> to vector<8x4xf32>
    %83 = vector.extract_strided_slice %3 {offsets = [2, 0], sizes = [1, 4], strides = [1, 1]} : vector<4x4xf32> to vector<1x4xf32>
    %84 = vector.extract_strided_slice %3 {offsets = [3, 0], sizes = [1, 4], strides = [1, 1]} : vector<4x4xf32> to vector<1x4xf32>
    %85 = vector.shape_cast %80 : vector<8x1xf32> to vector<1x8x1xf32>
    %86 = vector.broadcast %85 : vector<1x8x1xf32> to vector<2x8x256xf32>
    %87 = arith.mulf %0, %86 : vector<2x8x256xf32>
    %cst_22 = arith.constant dense<0.000000e+00> : vector<2x256xf32>
    %88 = vector.multi_reduction <add>, %87, %cst_22 [1] : vector<2x8x256xf32> to vector<2x256xf32>
    %89 = vector.shape_cast %88 : vector<2x256xf32> to vector<2x1x256xf32>
    %cst_23 = arith.constant dense<0xFF800000> : vector<2x1xf32>
    %90 = vector.multi_reduction <maximumf>, %89, %cst_23 [2] : vector<2x1x256xf32> to vector<2x1xf32>
    %91 = vector.shape_cast %90 : vector<2x1xf32> to vector<2x1x1xf32>
    %92 = vector.broadcast %91 : vector<2x1x1xf32> to vector<2x1x256xf32>
    %93 = arith.subf %89, %92 : vector<2x1x256xf32>
    %94 = math.exp %93 : vector<2x1x256xf32>
    %cst_24 = arith.constant dense<0.000000e+00> : vector<2x1xf32>
    %95 = vector.multi_reduction <add>, %94, %cst_24 [2] : vector<2x1x256xf32> to vector<2x1xf32>
    %96 = vector.shape_cast %95 : vector<2x1xf32> to vector<2x1x1xf32>
    %97 = tpu.reciprocal %96 {approx = true} : vector<2x1x1xf32> -> vector<2x1x1xf32>
    %98 = vector.broadcast %97 : vector<2x1x1xf32> to vector<2x1x256xf32>
    %99 = arith.mulf %94, %98 : vector<2x1x256xf32>
    %100 = vector.broadcast %99 : vector<2x1x256xf32> to vector<2x8x256xf32>
    %101 = arith.mulf %0, %100 : vector<2x8x256xf32>
    %cst_25 = arith.constant dense<0.000000e+00> : vector<2x8xf32>
    %102 = vector.multi_reduction <add>, %101, %cst_25 [2] : vector<2x8x256xf32> to vector<2x8xf32>
    %103 = vector.shape_cast %102 : vector<2x8xf32> to vector<2x8x1xf32>
    %104 = vector.shape_cast %81 : vector<8x4xf32> to vector<1x8x4xf32>
    %105 = vector.broadcast %104 : vector<1x8x4xf32> to vector<2x8x4xf32>
    %106 = vector.broadcast %103 : vector<2x8x1xf32> to vector<2x8x4xf32>
    %107 = arith.mulf %105, %106 : vector<2x8x4xf32>
    %cst_26 = arith.constant dense<0.000000e+00> : vector<2x4xf32>
    %108 = vector.multi_reduction <add>, %107, %cst_26 [1] : vector<2x8x4xf32> to vector<2x4xf32>
    %109 = vector.shape_cast %108 : vector<2x4xf32> to vector<2x1x4xf32>
    %cst_27 = arith.constant dense<0.000000e+00> : vector<2x1xf32>
    %110 = vector.multi_reduction <add>, %109, %cst_27 [2] : vector<2x1x4xf32> to vector<2x1xf32>
    %111 = vector.shape_cast %110 : vector<2x1xf32> to vector<2x1x1xf32>
    %cst_28 = arith.constant 4.000000e+00 : f32
    %112 = vector.broadcast %cst_28 : f32 to vector<2x1x1xf32>
    %113 = arith.divf %111, %112 : vector<2x1x1xf32>
    %114 = vector.broadcast %113 : vector<2x1x1xf32> to vector<2x1x4xf32>
    %115 = arith.subf %109, %114 : vector<2x1x4xf32>
    %116 = arith.mulf %115, %115 : vector<2x1x4xf32>
    %cst_29 = arith.constant dense<0.000000e+00> : vector<2x1xf32>
    %117 = vector.multi_reduction <add>, %116, %cst_29 [2] : vector<2x1x4xf32> to vector<2x1xf32>
    %118 = vector.shape_cast %117 : vector<2x1xf32> to vector<2x1x1xf32>
    %cst_30 = arith.constant 4.000000e+00 : f32
    %119 = vector.broadcast %cst_30 : f32 to vector<2x1x1xf32>
    %120 = arith.divf %118, %119 : vector<2x1x1xf32>
    %121 = vector.broadcast %113 : vector<2x1x1xf32> to vector<2x1x4xf32>
    %122 = arith.subf %109, %121 : vector<2x1x4xf32>
    %cst_31 = arith.constant 9.99999974E-6 : f32
    %123 = vector.broadcast %cst_31 : f32 to vector<2x1x1xf32>
    %124 = arith.addf %120, %123 : vector<2x1x1xf32>
    %125 = math.rsqrt %124 : vector<2x1x1xf32>
    %126 = vector.broadcast %125 : vector<2x1x1xf32> to vector<2x1x4xf32>
    %127 = arith.mulf %122, %126 : vector<2x1x4xf32>
    %128 = vector.shape_cast %83 : vector<1x4xf32> to vector<1x1x4xf32>
    %129 = vector.broadcast %128 : vector<1x1x4xf32> to vector<2x1x4xf32>
    %130 = arith.mulf %127, %129 : vector<2x1x4xf32>
    %131 = vector.shape_cast %84 : vector<1x4xf32> to vector<1x1x4xf32>
    %132 = vector.broadcast %131 : vector<1x1x4xf32> to vector<2x1x4xf32>
    %133 = arith.addf %130, %132 : vector<2x1x4xf32>
    %cst_32 = arith.constant 0.000000e+00 : f32
    %134 = vector.broadcast %cst_32 : f32 to vector<2x1x4xf32>
    %135 = arith.maximumf %133, %134 : vector<2x1x4xf32>
    %136 = vector.shape_cast %82 : vector<8x4xf32> to vector<1x8x4xf32>
    %137 = vector.broadcast %136 : vector<1x8x4xf32> to vector<2x8x4xf32>
    %138 = vector.broadcast %135 : vector<2x1x4xf32> to vector<2x8x4xf32>
    %139 = arith.mulf %137, %138 : vector<2x8x4xf32>
    %cst_33 = arith.constant dense<0.000000e+00> : vector<2x8xf32>
    %140 = vector.multi_reduction <add>, %139, %cst_33 [2] : vector<2x8x4xf32> to vector<2x8xf32>
    %141 = vector.shape_cast %140 : vector<2x8xf32> to vector<2x8x1xf32>
    %142 = arith.negf %141 : vector<2x8x1xf32>
    %143 = math.exp %142 : vector<2x8x1xf32>
    %cst_34 = arith.constant 1.000000e+00 : f32
    %144 = vector.broadcast %cst_34 : f32 to vector<2x8x1xf32>
    %145 = arith.addf %144, %143 : vector<2x8x1xf32>
    %146 = arith.divf %144, %145 : vector<2x8x1xf32>
    %147 = vector.broadcast %146 : vector<2x8x1xf32> to vector<2x8x256xf32>
    %148 = arith.mulf %0, %147 : vector<2x8x256xf32>
    %149 = arith.negf %148 : vector<2x8x256xf32>
    %150 = math.exp %149 : vector<2x8x256xf32>
    %cst_35 = arith.constant 1.000000e+00 : f32
    %151 = vector.broadcast %cst_35 : f32 to vector<2x8x256xf32>
    %152 = arith.addf %151, %150 : vector<2x8x256xf32>
    %153 = arith.divf %151, %152 : vector<2x8x256xf32>
    %154 = arith.mulf %1, %153 : vector<2x8x256xf32>
    %155 = arith.addf %154, %1 : vector<2x8x256xf32>
    %c0_36 = arith.constant 0 : index
    %c0_37 = arith.constant 0 : index
    %c0_38 = arith.constant 0 : index
    %156 = vector.load %arg9[%c0_36, %c0_37, %c0_38] : memref<2x8x256xf32, #tpu.memory_space<vmem>>, vector<2x8x256xf32>
    tpu.vector_store %arg9[%c0_36, %c0_37, %c0_38], %72 {strides = array<i32>} : memref<2x8x256xf32, #tpu.memory_space<vmem>>, vector<2x8x256xf32>,
    %c0_39 = arith.constant 0 : index
    %c0_40 = arith.constant 0 : index
    %157 = vector.load %arg3[%c0_39, %c0_40] : memref<9x512xf32, #tpu.memory_space<vmem>>, vector<9x512xf32>
    %c0_41 = arith.constant 0 : index
    %c0_42 = arith.constant 0 : index
    %158 = vector.load %arg6[%c0_41, %c0_42] : memref<24x144xbf16, #tpu.memory_space<vmem>>, vector<24x144xbf16>
    %c0_43 = arith.constant 0 : index
    %c0_44 = arith.constant 0 : index
    %159 = vector.load %arg7[%c0_43, %c0_44] : memref<24x2xf32, #tpu.memory_space<vmem>>, vector<24x2xf32>
    %160 = vector.extract_strided_slice %79 {offsets = [0, 0, 0], sizes = [1, 8, 256], strides = [1, 1, 1]} : vector<2x8x256xf32> to vector<1x8x256xf32>
    %161 = vector.shape_cast %160 : vector<1x8x256xf32> to vector<8x256xf32>
    %162 = vector.extract_strided_slice %79 {offsets = [1, 0, 0], sizes = [1, 8, 256], strides = [1, 1, 1]} : vector<2x8x256xf32> to vector<1x8x256xf32>
    %163 = vector.shape_cast %162 : vector<1x8x256xf32> to vector<8x256xf32>
    %164 = tpu.concatenate %161, %163 in 1 : vector<8x256xf32>, vector<8x256xf32> -> vector<8x512xf32>
    %165 = vector.extract_strided_slice %155 {offsets = [0, 0, 0], sizes = [1, 8, 256], strides = [1, 1, 1]} : vector<2x8x256xf32> to vector<1x8x256xf32>
    %166 = vector.shape_cast %165 : vector<1x8x256xf32> to vector<8x256xf32>
    %167 = vector.extract_strided_slice %155 {offsets = [1, 0, 0], sizes = [1, 8, 256], strides = [1, 1, 1]} : vector<2x8x256xf32> to vector<1x8x256xf32>
    %168 = vector.shape_cast %167 : vector<1x8x256xf32> to vector<8x256xf32>
    %169 = tpu.concatenate %166, %168 in 1 : vector<8x256xf32>, vector<8x256xf32> -> vector<8x512xf32>
    %170 = tpu.concatenate %164, %169 in 0 : vector<8x512xf32>, vector<8x512xf32> -> vector<16x512xf32>
    %c17_i32 = arith.constant 17 : i32
    %171 = tpu.dynamic_rotate %170 by %c17_i32 dim 1 : vector<16x512xf32>, i32 -> vector<16x512xf32>
    %172 = vector.extract_strided_slice %157 {offsets = [0, 0], sizes = [1, 512], strides = [1, 1]} : vector<9x512xf32> to vector<1x512xf32>
    %173 = vector.broadcast %172 : vector<1x512xf32> to vector<16x512xf32>
    %174 = arith.mulf %171, %173 : vector<16x512xf32>
    %175 = arith.truncf %174 : vector<16x512xf32> to vector<16x512xbf16>
    %c16_i32 = arith.constant 16 : i32
    %176 = tpu.dynamic_rotate %170 by %c16_i32 dim 1 : vector<16x512xf32>, i32 -> vector<16x512xf32>
    %177 = vector.extract_strided_slice %157 {offsets = [1, 0], sizes = [1, 512], strides = [1, 1]} : vector<9x512xf32> to vector<1x512xf32>
    %178 = vector.broadcast %177 : vector<1x512xf32> to vector<16x512xf32>
    %179 = arith.mulf %176, %178 : vector<16x512xf32>
    %180 = arith.truncf %179 : vector<16x512xf32> to vector<16x512xbf16>
    %c15_i32 = arith.constant 15 : i32
    %181 = tpu.dynamic_rotate %170 by %c15_i32 dim 1 : vector<16x512xf32>, i32 -> vector<16x512xf32>
    %182 = vector.extract_strided_slice %157 {offsets = [2, 0], sizes = [1, 512], strides = [1, 1]} : vector<9x512xf32> to vector<1x512xf32>
    %183 = vector.broadcast %182 : vector<1x512xf32> to vector<16x512xf32>
    %184 = arith.mulf %181, %183 : vector<16x512xf32>
    %185 = arith.truncf %184 : vector<16x512xf32> to vector<16x512xbf16>
    %c1_i32 = arith.constant 1 : i32
    %186 = tpu.dynamic_rotate %170 by %c1_i32 dim 1 : vector<16x512xf32>, i32 -> vector<16x512xf32>
    %187 = vector.extract_strided_slice %157 {offsets = [3, 0], sizes = [1, 512], strides = [1, 1]} : vector<9x512xf32> to vector<1x512xf32>
    %188 = vector.broadcast %187 : vector<1x512xf32> to vector<16x512xf32>
    %189 = arith.mulf %186, %188 : vector<16x512xf32>
    %190 = arith.truncf %189 : vector<16x512xf32> to vector<16x512xbf16>
    %191 = arith.truncf %170 : vector<16x512xf32> to vector<16x512xbf16>
    %c511_i32 = arith.constant 511 : i32
    %192 = tpu.dynamic_rotate %170 by %c511_i32 dim 1 : vector<16x512xf32>, i32 -> vector<16x512xf32>
    %193 = vector.extract_strided_slice %157 {offsets = [5, 0], sizes = [1, 512], strides = [1, 1]} : vector<9x512xf32> to vector<1x512xf32>
    %194 = vector.broadcast %193 : vector<1x512xf32> to vector<16x512xf32>
    %195 = arith.mulf %192, %194 : vector<16x512xf32>
    %196 = arith.truncf %195 : vector<16x512xf32> to vector<16x512xbf16>
    %c497_i32 = arith.constant 497 : i32
    %197 = tpu.dynamic_rotate %170 by %c497_i32 dim 1 : vector<16x512xf32>, i32 -> vector<16x512xf32>
    %198 = vector.extract_strided_slice %157 {offsets = [6, 0], sizes = [1, 512], strides = [1, 1]} : vector<9x512xf32> to vector<1x512xf32>
    %199 = vector.broadcast %198 : vector<1x512xf32> to vector<16x512xf32>
    %200 = arith.mulf %197, %199 : vector<16x512xf32>
    %201 = arith.truncf %200 : vector<16x512xf32> to vector<16x512xbf16>
    %c496_i32 = arith.constant 496 : i32
    %202 = tpu.dynamic_rotate %170 by %c496_i32 dim 1 : vector<16x512xf32>, i32 -> vector<16x512xf32>
    %203 = vector.extract_strided_slice %157 {offsets = [7, 0], sizes = [1, 512], strides = [1, 1]} : vector<9x512xf32> to vector<1x512xf32>
    %204 = vector.broadcast %203 : vector<1x512xf32> to vector<16x512xf32>
    %205 = arith.mulf %202, %204 : vector<16x512xf32>
    %206 = arith.truncf %205 : vector<16x512xf32> to vector<16x512xbf16>
    %c495_i32 = arith.constant 495 : i32
    %207 = tpu.dynamic_rotate %170 by %c495_i32 dim 1 : vector<16x512xf32>, i32 -> vector<16x512xf32>
    %208 = vector.extract_strided_slice %157 {offsets = [8, 0], sizes = [1, 512], strides = [1, 1]} : vector<9x512xf32> to vector<1x512xf32>
    %209 = vector.broadcast %208 : vector<1x512xf32> to vector<16x512xf32>
    %210 = arith.mulf %207, %209 : vector<16x512xf32>
    %211 = arith.truncf %210 : vector<16x512xf32> to vector<16x512xbf16>
    %212 = tpu.concatenate %175, %180, %185, %190, %191, %196, %201, %206, %211 in 0 : vector<16x512xbf16>, vector<16x512xbf16>, vector<16x512xbf16>, vector<16x512xbf16>, vector<16x512xbf16>, vector<16x512xbf16>, vector<16x512xbf16>, vector<16x512xbf16>, vector<16x512xbf16> -> vector<144x512xbf16>
    %213 = vector.extract_strided_slice %158 {offsets = [0, 0], sizes = [16, 144], strides = [1, 1]} : vector<24x144xbf16> to vector<16x144xbf16>
    %214 = vector.extract_strided_slice %159 {offsets = [0, 0], sizes = [16, 1], strides = [1, 1]} : vector<24x2xf32> to vector<16x1xf32>
    %215 = vector.extract_strided_slice %159 {offsets = [0, 1], sizes = [16, 1], strides = [1, 1]} : vector<24x2xf32> to vector<16x1xf32>
    %cst_45 = arith.constant dense<0.000000e+00> : vector<16x512xf32>
    %216 = tpu.matmul %213, %212, %cst_45 {dimension_numbers = #tpu.dot_dimension_numbers<[1], [0], [0], [1], [0, 0, 1, 1], [], []>} : vector<16x144xbf16>, vector<144x512xbf16>, vector<16x512xf32> -> vector<16x512xf32>
    %217 = vector.broadcast %214 : vector<16x1xf32> to vector<16x512xf32>
    %218 = arith.mulf %216, %217 : vector<16x512xf32>
    %219 = vector.broadcast %215 : vector<16x1xf32> to vector<16x512xf32>
    %220 = arith.addf %218, %219 : vector<16x512xf32>
    %cst_46 = arith.constant 0.000000e+00 : f32
    %221 = vector.broadcast %cst_46 : f32 to vector<16x512xf32>
    %222 = arith.maximumf %220, %221 : vector<16x512xf32>
    %223 = vector.extract_strided_slice %222 {offsets = [0, 0], sizes = [8, 512], strides = [1, 1]} : vector<16x512xf32> to vector<8x512xf32>
    %224 = vector.extract_strided_slice %222 {offsets = [8, 0], sizes = [8, 512], strides = [1, 1]} : vector<16x512xf32> to vector<8x512xf32>
    %225 = arith.maximumf %223, %224 : vector<8x512xf32>
    %226 = arith.addf %223, %224 : vector<8x512xf32>
    %cst_47 = arith.constant 5.000000e-01 : f32
    %227 = vector.broadcast %cst_47 : f32 to vector<8x512xf32>
    %228 = arith.mulf %226, %227 : vector<8x512xf32>
    %229 = tpu.concatenate %225, %228 in 0 : vector<8x512xf32>, vector<8x512xf32> -> vector<16x512xf32>
    %c17_i32_48 = arith.constant 17 : i32
    %230 = tpu.dynamic_rotate %229 by %c17_i32_48 dim 1 : vector<16x512xf32>, i32 -> vector<16x512xf32>
    %231 = vector.extract_strided_slice %157 {offsets = [0, 0], sizes = [1, 512], strides = [1, 1]} : vector<9x512xf32> to vector<1x512xf32>
    %232 = vector.broadcast %231 : vector<1x512xf32> to vector<16x512xf32>
    %233 = arith.mulf %230, %232 : vector<16x512xf32>
    %234 = arith.truncf %233 : vector<16x512xf32> to vector<16x512xbf16>
    %c16_i32_49 = arith.constant 16 : i32
    %235 = tpu.dynamic_rotate %229 by %c16_i32_49 dim 1 : vector<16x512xf32>, i32 -> vector<16x512xf32>
    %236 = vector.extract_strided_slice %157 {offsets = [1, 0], sizes = [1, 512], strides = [1, 1]} : vector<9x512xf32> to vector<1x512xf32>
    %237 = vector.broadcast %236 : vector<1x512xf32> to vector<16x512xf32>
    %238 = arith.mulf %235, %237 : vector<16x512xf32>
    %239 = arith.truncf %238 : vector<16x512xf32> to vector<16x512xbf16>
    %c15_i32_50 = arith.constant 15 : i32
    %240 = tpu.dynamic_rotate %229 by %c15_i32_50 dim 1 : vector<16x512xf32>, i32 -> vector<16x512xf32>
    %241 = vector.extract_strided_slice %157 {offsets = [2, 0], sizes = [1, 512], strides = [1, 1]} : vector<9x512xf32> to vector<1x512xf32>
    %242 = vector.broadcast %241 : vector<1x512xf32> to vector<16x512xf32>
    %243 = arith.mulf %240, %242 : vector<16x512xf32>
    %244 = arith.truncf %243 : vector<16x512xf32> to vector<16x512xbf16>
    %c1_i32_51 = arith.constant 1 : i32
    %245 = tpu.dynamic_rotate %229 by %c1_i32_51 dim 1 : vector<16x512xf32>, i32 -> vector<16x512xf32>
    %246 = vector.extract_strided_slice %157 {offsets = [3, 0], sizes = [1, 512], strides = [1, 1]} : vector<9x512xf32> to vector<1x512xf32>
    %247 = vector.broadcast %246 : vector<1x512xf32> to vector<16x512xf32>
    %248 = arith.mulf %245, %247 : vector<16x512xf32>
    %249 = arith.truncf %248 : vector<16x512xf32> to vector<16x512xbf16>
    %250 = arith.truncf %229 : vector<16x512xf32> to vector<16x512xbf16>
    %c511_i32_52 = arith.constant 511 : i32
    %251 = tpu.dynamic_rotate %229 by %c511_i32_52 dim 1 : vector<16x512xf32>, i32 -> vector<16x512xf32>
    %252 = vector.extract_strided_slice %157 {offsets = [5, 0], sizes = [1, 512], strides = [1, 1]} : vector<9x512xf32> to vector<1x512xf32>
    %253 = vector.broadcast %252 : vector<1x512xf32> to vector<16x512xf32>
    %254 = arith.mulf %251, %253 : vector<16x512xf32>
    %255 = arith.truncf %254 : vector<16x512xf32> to vector<16x512xbf16>
    %c497_i32_53 = arith.constant 497 : i32
    %256 = tpu.dynamic_rotate %229 by %c497_i32_53 dim 1 : vector<16x512xf32>, i32 -> vector<16x512xf32>
    %257 = vector.extract_strided_slice %157 {offsets = [6, 0], sizes = [1, 512], strides = [1, 1]} : vector<9x512xf32> to vector<1x512xf32>
    %258 = vector.broadcast %257 : vector<1x512xf32> to vector<16x512xf32>
    %259 = arith.mulf %256, %258 : vector<16x512xf32>
    %260 = arith.truncf %259 : vector<16x512xf32> to vector<16x512xbf16>
    %c496_i32_54 = arith.constant 496 : i32
    %261 = tpu.dynamic_rotate %229 by %c496_i32_54 dim 1 : vector<16x512xf32>, i32 -> vector<16x512xf32>
    %262 = vector.extract_strided_slice %157 {offsets = [7, 0], sizes = [1, 512], strides = [1, 1]} : vector<9x512xf32> to vector<1x512xf32>
    %263 = vector.broadcast %262 : vector<1x512xf32> to vector<16x512xf32>
    %264 = arith.mulf %261, %263 : vector<16x512xf32>
    %265 = arith.truncf %264 : vector<16x512xf32> to vector<16x512xbf16>
    %c495_i32_55 = arith.constant 495 : i32
    %266 = tpu.dynamic_rotate %229 by %c495_i32_55 dim 1 : vector<16x512xf32>, i32 -> vector<16x512xf32>
    %267 = vector.extract_strided_slice %157 {offsets = [8, 0], sizes = [1, 512], strides = [1, 1]} : vector<9x512xf32> to vector<1x512xf32>
    %268 = vector.broadcast %267 : vector<1x512xf32> to vector<16x512xf32>
    %269 = arith.mulf %266, %268 : vector<16x512xf32>
    %270 = arith.truncf %269 : vector<16x512xf32> to vector<16x512xbf16>
    %271 = tpu.concatenate %234, %239, %244, %249, %250, %255, %260, %265, %270 in 0 : vector<16x512xbf16>, vector<16x512xbf16>, vector<16x512xbf16>, vector<16x512xbf16>, vector<16x512xbf16>, vector<16x512xbf16>, vector<16x512xbf16>, vector<16x512xbf16>, vector<16x512xbf16> -> vector<144x512xbf16>
    %272 = vector.extract_strided_slice %158 {offsets = [16, 0], sizes = [8, 144], strides = [1, 1]} : vector<24x144xbf16> to vector<8x144xbf16>
    %273 = vector.extract_strided_slice %159 {offsets = [16, 0], sizes = [8, 1], strides = [1, 1]} : vector<24x2xf32> to vector<8x1xf32>
    %274 = vector.extract_strided_slice %159 {offsets = [16, 1], sizes = [8, 1], strides = [1, 1]} : vector<24x2xf32> to vector<8x1xf32>
    %cst_56 = arith.constant dense<0.000000e+00> : vector<8x512xf32>
    %275 = tpu.matmul %272, %271, %cst_56 {dimension_numbers = #tpu.dot_dimension_numbers<[1], [0], [0], [1], [0, 0, 1, 1], [], []>} : vector<8x144xbf16>, vector<144x512xbf16>, vector<8x512xf32> -> vector<8x512xf32>
    %276 = vector.broadcast %273 : vector<8x1xf32> to vector<8x512xf32>
    %277 = arith.mulf %275, %276 : vector<8x512xf32>
    %278 = vector.broadcast %274 : vector<8x1xf32> to vector<8x512xf32>
    %279 = arith.addf %277, %278 : vector<8x512xf32>
    %cst_57 = arith.constant 0.000000e+00 : f32
    %280 = vector.broadcast %cst_57 : f32 to vector<8x512xf32>
    %281 = arith.maximumf %279, %280 : vector<8x512xf32>
    %282 = vector.extract_strided_slice %281 {offsets = [0, 0], sizes = [8, 256], strides = [1, 1]} : vector<8x512xf32> to vector<8x256xf32>
    %c0_58 = arith.constant 0 : index
    %c0_59 = arith.constant 0 : index
    %c0_60 = arith.constant 0 : index
    %283 = vector.load %arg8[%c0_58, %c0_59, %c0_60] : memref<2x8x256xf32, #tpu.memory_space<vmem>>, vector<1x8x256xf32>
    %284 = vector.shape_cast %283 : vector<1x8x256xf32> to vector<8x256xf32>
    %285 = vector.shape_cast %282 : vector<8x256xf32> to vector<1x8x256xf32>
    tpu.vector_store %arg8[%c0_58, %c0_59, %c0_60], %285 {strides = array<i32>} : memref<2x8x256xf32, #tpu.memory_space<vmem>>, vector<1x8x256xf32>,
    %286 = vector.extract_strided_slice %281 {offsets = [0, 256], sizes = [8, 256], strides = [1, 1]} : vector<8x512xf32> to vector<8x256xf32>
    %c1 = arith.constant 1 : index
    %c0_61 = arith.constant 0 : index
    %c0_62 = arith.constant 0 : index
    %287 = vector.load %arg8[%c1, %c0_61, %c0_62] : memref<2x8x256xf32, #tpu.memory_space<vmem>>, vector<1x8x256xf32>
    %288 = vector.shape_cast %287 : vector<1x8x256xf32> to vector<8x256xf32>
    %289 = vector.shape_cast %286 : vector<8x256xf32> to vector<1x8x256xf32>
    tpu.vector_store %arg8[%c1, %c0_61, %c0_62], %289 {strides = array<i32>} : memref<2x8x256xf32, #tpu.memory_space<vmem>>, vector<1x8x256xf32>,
    return
  }
  func.func @transform_0(%arg0: i32) -> (i32, i32, i32) {
    %c0_i32 = arith.constant 0 : i32
    %c0_i32_0 = arith.constant 0 : i32
    %c0_i32_1 = arith.constant 0 : i32
    return %arg0, %c0_i32, %c0_i32_0 : i32, i32, i32
  }
  func.func @transform_1(%arg0: i32) -> (i32, i32, i32) {
    %c0_i32 = arith.constant 0 : i32
    %c0_i32_0 = arith.constant 0 : i32
    %c0_i32_1 = arith.constant 0 : i32
    return %arg0, %c0_i32, %c0_i32_0 : i32, i32, i32
  }
  func.func @transform_2(%arg0: i32) -> (i32, i32) {
    %c0_i32 = arith.constant 0 : i32
    %c0_i32_0 = arith.constant 0 : i32
    %c0_i32_1 = arith.constant 0 : i32
    return %c0_i32, %c0_i32_0 : i32, i32
  }
  func.func @transform_3(%arg0: i32) -> (i32, i32) {
    %c0_i32 = arith.constant 0 : i32
    %c0_i32_0 = arith.constant 0 : i32
    %c0_i32_1 = arith.constant 0 : i32
    return %c0_i32, %c0_i32_0 : i32, i32
  }
  func.func @transform_4(%arg0: i32) -> (i32, i32) {
    %c0_i32 = arith.constant 0 : i32
    %c0_i32_0 = arith.constant 0 : i32
    %c0_i32_1 = arith.constant 0 : i32
    return %c0_i32, %c0_i32_0 : i32, i32
  }
  func.func @transform_5(%arg0: i32) -> (i32, i32) {
    %c0_i32 = arith.constant 0 : i32
    %c0_i32_0 = arith.constant 0 : i32
    %c0_i32_1 = arith.constant 0 : i32
    return %c0_i32, %c0_i32_0 : i32, i32
  }
  func.func @transform_6(%arg0: i32) -> (i32, i32) {
    %c0_i32 = arith.constant 0 : i32
    %c0_i32_0 = arith.constant 0 : i32
    %c0_i32_1 = arith.constant 0 : i32
    return %c0_i32, %c0_i32_0 : i32, i32
  }
  func.func @transform_7(%arg0: i32) -> (i32, i32, i32) {
    %c0_i32 = arith.constant 0 : i32
    %c0_i32_0 = arith.constant 0 : i32
    %c0_i32_1 = arith.constant 0 : i32
    return %arg0, %c0_i32, %c0_i32_0 : i32, i32, i32
  }
  func.func @transform_8(%arg0: i32) -> (i32, i32, i32) {
    %c0_i32 = arith.constant 0 : i32
    %c0_i32_0 = arith.constant 0 : i32
    %c0_i32_1 = arith.constant 0 : i32
    return %arg0, %c0_i32, %c0_i32_0 : i32, i32, i32
  }
}

</mosaic_0001>

<bundles_post_ra>
// kernel: egf_forward.1
= control target key start
LH: loop header
LB: loop body
LE: loop exit
PB: predicated region body
PF: predicated region fallthrough
CT: control target
= control target key end

     0   :  { %v1643_v0 = vmov 0   ;;  %v1644_v2 = vmov 9   ;;  %vm114_vm0 = vcmask 39944   ;;  %vm341_vm1 = vcmask 113744   ;;  %s1646_s21 = smov 118   ;;  %s1647_s24 = smov 10   ;;  %s2844_s3 = inlined_call_operand.vmem [shape: f32[8,18], index: 3, kind: input, shape index: {}]   ;;  %s2845_s1 = inlined_call_operand.vmem [shape: f32[2,8,256], index: 1, kind: input, shape index: {}]   ;;  %s2846_s0 = inlined_call_operand.vmem [shape: f32[2,8,256], index: 0, kind: input, shape index: {}]   ;;  %s2847_s4 = inlined_call_operand.vmem [shape: f32[4,4], index: 4, kind: input, shape index: {}]   ;;  %s2848_s8 = inlined_call_operand.vmem [shape: f32[2,8,256], index: 8, kind: output, shape index: {1}]   ;;  %s2849_s2 = inlined_call_operand.vmem [shape: f32[9,512], index: 2, kind: input, shape index: {}]   ;;  %s2850_s5 = inlined_call_operand.vmem [shape: bf16[24,144], index: 5, kind: input, shape index: {}]   ;;  %s2851_s6 = inlined_call_operand.vmem [shape: f32[24,2], index: 6, kind: input, shape index: {}]   ;;  %s2852_s7 = inlined_call_operand.vmem [shape: f32[2,8,256], index: 7, kind: output, shape index: {0}]  }
   0x1   :  { %1552 = vset.pattern.permute.xlu0 %v1643_v0  ;;  %v1707_v1 = vld [vmem:[%s2844_s3] sm:$0xff]  ;;  %1554 = vset.pattern.permute.xlu1 %v1643_v0  ;;  %v1714_v3 = vld [vmem:[%s2845_s1 + $0x10] sm:$0xff]  ;;  %v1719_v4 = vld [vmem:[%s2845_s1 + $0x18] sm:$0xff]  ;;  %vm137_vm2 = vcmask 31744   ;;  %s1648_s25 = smov 1   ;;  %s1650_s26 = smov 123  }
   0x2   :  { %41 = vperm.xlu0 %1552, %v1707_v1   ;;  %v1724_v5 = vld [vmem:[%s2845_s1] sm:$0xff]  ;;  %v1729_v6 = vld [vmem:[%s2845_s1 + $0x8] sm:$0xff]  ;;  %v1748_v14 = vld [vmem:[%s2846_s0 + $0x10] sm:$0xff]  ;;  %s1651_s27 = smov 114   ;;  %s1653_s13 = smov 16   ;;  %vm949_vm4 = vcmask 130048  }
   0x3   :  { %v1738_v12 = vld [vmem:[%s2846_s0] sm:$0xff]  ;;  %v1743_v13 = vld [vmem:[%s2846_s0 + $0x8] sm:$0xff]  ;;  %v1753_v15 = vld [vmem:[%s2846_s0 + $0x18] sm:$0xff]  ;;  %s1645_s0 = smov 127   ;;  %s1654_s14 = smov 15  }
   0x4   :  { %s1655_s15 = smov 113   ;;  %s1656_s16 = smov 112  }
   0x5   :  { %s1657_s17 = smov 111  }
   0x6   :  { %1553 = vset.pattern.permute.xlu0 %v1644_v2 }
   0x7   :  { %268 = vperm.xlu0 %1553, %v1707_v1  }
   0xb   :  { %1555 = vset.pattern.permute.xlu0 %v1643_v0 }
  0x81   :  { %v42_v7 = vpop.permute.xlu0 %41 }
  0x82   :  { %v46_v8 = vmul.f32 %v42_v7, %v1714_v3  ;;  %v47_v9 = vmul.f32 %v42_v7, %v1719_v4  ;;  %v44_v10 = vmul.f32 %v42_v7, %v1724_v5  ;;  %v45_v11 = vmul.f32 %v42_v7, %v1729_v6 }
  0x84   :  { %v48_v16 = vrot.slane %v44_v10, 4  ;;  %v54_v17 = vrot.slane %v45_v11, 4  ;;  %v60_v18 = vrot.slane %v46_v8, 4  ;;  %v66_v19 = vrot.slane %v47_v9, 4 }
  0x86   :  { %v269_v20 = vpop.permute.xlu0 %268  ;;  %v49_v21 = vadd.f32 %v48_v16, %v44_v10  ;;  %v55_v22 = vadd.f32 %v54_v17, %v45_v11  ;;  %v61_v23 = vadd.f32 %v60_v18, %v46_v8  ;;  %v67_v24 = vadd.f32 %v66_v19, %v47_v9 }
  0x87   :  { %v271_v25 = vmul.f32 %v269_v20, %v1738_v12  ;;  %v272_v26 = vmul.f32 %v269_v20, %v1743_v13  ;;  %v273_v27 = vmul.f32 %v269_v20, %v1748_v14  ;;  %v274_v28 = vmul.f32 %v269_v20, %v1753_v15 }
  0x88   :  { %v50_v29 = vrot.slane %v49_v21, 2  ;;  %v56_v30 = vrot.slane %v55_v22, 2  ;;  %v62_v31 = vrot.slane %v61_v23, 2  ;;  %v68_v32 = vrot.slane %v67_v24, 2 }
  0x89   :  { %v287_v33 = vrot.slane %v273_v27, 4  ;;  %v293_v34 = vrot.slane %v274_v28, 4  ;;  %v275_v35 = vrot.slane %v271_v25, 4  ;;  %v281_v36 = vrot.slane %v272_v26, 4 }
  0x8a   :  { %v51_v37 = vadd.f32 %v50_v29, %v49_v21  ;;  %v57_v38 = vadd.f32 %v56_v30, %v55_v22  ;;  %v63_v39 = vadd.f32 %v62_v31, %v61_v23  ;;  %v69_v40 = vadd.f32 %v68_v32, %v67_v24 }
  0x8b   :  { %v288_v41 = vadd.f32 %v287_v33, %v273_v27  ;;  %v294_v42 = vadd.f32 %v293_v34, %v274_v28  ;;  %v276_v43 = vadd.f32 %v275_v35, %v271_v25  ;;  %v282_v44 = vadd.f32 %v281_v36, %v272_v26 }
  0x8c   :  { %v52_v45 = vrot.slane %v51_v37, 1  ;;  %v58_v46 = vrot.slane %v57_v38, 1  ;;  %v64_v47 = vrot.slane %v63_v39, 1  ;;  %v70_v48 = vrot.slane %v69_v40, 1 }
  0x8d   :  { %v289_v49 = vrot.slane %v288_v41, 2  ;;  %v295_v50 = vrot.slane %v294_v42, 2  ;;  %v277_v51 = vrot.slane %v276_v43, 2  ;;  %v283_v52 = vrot.slane %v282_v44, 2 }
  0x8e   :  { %v53_v53 = vadd.f32 %v52_v45, %v51_v37  ;;  %v59_v54 = vadd.f32 %v58_v46, %v57_v38  ;;  %v65_v60 = vadd.f32 %v64_v47, %v63_v39  ;;  %v71_v61 = vadd.f32 %v70_v48, %v69_v40 }
  0x8f   :  { %v290_v55 = vadd.f32 %v289_v49, %v288_v41  ;;  %v296_v56 = vadd.f32 %v295_v50, %v294_v42  ;;  %v278_v57 = vadd.f32 %v277_v51, %v276_v43  ;;  %v284_v58 = vadd.f32 %v283_v52, %v282_v44 }
  0x90   :  { %v72_v59 = vmax.f32 %v53_v53, %v59_v54  ;;  %v75_v11 = vmax.f32 %v65_v60, %v71_v61 }
  0x91   :  { %v291_v62 = vrot.slane %v290_v55, 1  ;;  %v297_v63 = vrot.slane %v296_v56, 1  ;;  %v279_v0 = vrot.slane %v278_v57, 1  ;;  %v285_v2 = vrot.slane %v284_v58, 1 }
  0x92   :  { %73 = vmax.xlane.f32.xlu1 %v72_v59 }
  0x93   :  { %v292_v7 = vadd.f32 %v291_v62, %v290_v55  ;;  %v298_v8 = vadd.f32 %v297_v63, %v296_v56  ;;  %v280_v9 = vadd.f32 %v279_v0, %v278_v57  ;;  %v286_v10 = vadd.f32 %v285_v2, %v284_v58 }
  0x95   :  { %v302_v16 = vmax.f32 %v292_v7, %v298_v8  ;;  %v299_v17 = vmax.f32 %v280_v9, %v286_v10 }
  0x96   :  { %76 = vmax.xlane.f32.xlu1 %v75_v11 }
  0x97   :  { %303 = vmax.xlane.f32.xlu0 %v302_v16 }
  0x9a   :  { %300 = vmax.xlane.f32.xlu1 %v299_v17 }
 0x11f   :  { %v74_v18 = vpop.xlane.xlu1 %73 }
 0x120   :  { %v78_v19 = vsub.f32 %v53_v53, %v74_v18  ;;  %v79_v20 = vsub.f32 %v59_v54, %v74_v18 }
 0x122   :  { %v82_v21 = vmul.f32 1.442695, %v78_v19  ;;  %v84_v22 = vmul.f32 1.442695, %v79_v20 }
 0x123   :  { %v77_v23 = vpop.xlane.xlu1 %76 }
 0x124   :  { %1563 = vpow2.f32 %v82_v21  ;;  %v80_v24 = vsub.f32 %v65_v60, %v77_v23  ;;  %v81_v25 = vsub.f32 %v71_v61, %v77_v23  ;;  %v304_v26 = vpop.xlane.xlu0 %303 }
 0x125   :  { %1565 = vpow2.f32 %v84_v22  ;;  %v307_v29 = vsub.f32 %v292_v7, %v304_v26  ;;  %v308_v30 = vsub.f32 %v298_v8, %v304_v26 }
 0x126   :  { %v86_v27 = vmul.f32 1.442695, %v80_v24  ;;  %v88_v28 = vmul.f32 1.442695, %v81_v25 }
 0x127   :  { %v301_v31 = vpop.xlane.xlu1 %300  ;;  %v313_v34 = vmul.f32 1.442695, %v307_v29  ;;  %v315_v37 = vmul.f32 1.442695, %v308_v30 }
 0x128   :  { %1567 = vpow2.f32 %v86_v27  ;;  %v305_v32 = vsub.f32 %v280_v9, %v301_v31  ;;  %v306_v33 = vsub.f32 %v286_v10, %v301_v31 }
 0x129   :  { %1569 = vpow2.f32 %v88_v28 }
 0x12a   :  { %v309_v35 = vmul.f32 1.442695, %v305_v32  ;;  %v311_v36 = vmul.f32 1.442695, %v306_v33 }
 0x12c   :  { %1571 = vpow2.f32 %v309_v35 }
 0x12d   :  { %1573 = vpow2.f32 %v311_v36 }
 0x12e   :  { %v1564_v38 = vpop.eup %1563  ;;  %1575 = vpow2.f32 %v313_v34 }
 0x12f   :  { %v1566_v39 = vpop.eup %1565  ;;  %1577 = vpow2.f32 %v315_v37 }
 0x130   :  { %v90_v40 = vadd.f32 %v1566_v39, %v1564_v38 }
 0x132   :  { %v1568_v41 = vpop.eup %1567  ;;  %91 = vadd.xlane.f32.xlu1 %v90_v40 }
 0x133   :  { %v1570_v42 = vpop.eup %1569 }
 0x134   :  { %v93_v43 = vadd.f32 %v1570_v42, %v1568_v41 }
 0x136   :  { %v1572_v44 = vpop.eup %1571  ;;  %94 = vadd.xlane.f32.xlu1 %v93_v43 }
 0x137   :  { %v1574_v45 = vpop.eup %1573 }
 0x138   :  { %v1576_v46 = vpop.eup %1575  ;;  %v317_v47 = vadd.f32 %v1574_v45, %v1572_v44 }
 0x139   :  { %v1578_v48 = vpop.eup %1577 }
 0x13a   :  { %318 = vadd.xlane.f32.xlu1 %v317_v47  ;;  %v320_v49 = vadd.f32 %v1578_v48, %v1576_v46 }
 0x13e   :  { %321 = vadd.xlane.f32.xlu1 %v320_v49 }
 0x1bf   :  { %v92_v50 = vpop.xlane.xlu1 %91 }
 0x1c0   :  { %1579 = vrcp.f32 %v92_v50 }
 0x1c3   :  { %v95_v51 = vpop.xlane.xlu1 %94 }
 0x1c4   :  { %1581 = vrcp.f32 %v95_v51 }
 0x1c7   :  { %v319_v52 = vpop.xlane.xlu1 %318 }
 0x1c8   :  { %1583 = vrcp.f32 %v319_v52 }
 0x1ca   :  { %v1580_v53 = vpop.eup %1579 }
 0x1cb   :  { %v322_v54 = vpop.xlane.xlu1 %321  ;;  %v98_v55 = vmul.f32 %v1580_v53, %v1564_v38  ;;  %v99_v56 = vmul.f32 %v1580_v53, %v1566_v39 }
 0x1cc   :  { %1585 = vrcp.f32 %v322_v54 }
 0x1cd   :  { %v102_v57 = vmul.f32 %v98_v55, %v1724_v5  ;;  %v103_v58 = vmul.f32 %v99_v56, %v1729_v6 }
 0x1ce   :  { %v1582_v59 = vpop.eup %1581 }
 0x1cf   :  { %v106_v60 = vadd.f32 %v103_v58, %v102_v57  ;;  %v100_v61 = vmul.f32 %v1582_v59, %v1568_v41  ;;  %v101_v62 = vmul.f32 %v1582_v59, %v1570_v42 }
 0x1d1   :  { %107 = vadd.xlane.f32.xlu1 %v106_v60  ;;  %v104_v63 = vmul.f32 %v100_v61, %v1714_v3  ;;  %v105_v0 = vmul.f32 %v101_v62, %v1719_v4 }
 0x1d2   :  { %v1584_v2 = vpop.eup %1583 }
 0x1d3   :  { %v109_v7 = vadd.f32 %v105_v0, %v104_v63  ;;  %v325_v8 = vmul.f32 %v1584_v2, %v1572_v44  ;;  %v326_v9 = vmul.f32 %v1584_v2, %v1574_v45 }
 0x1d5   :  { %110 = vadd.xlane.f32.xlu1 %v109_v7  ;;  %v329_v10 = vmul.f32 %v325_v8, %v1738_v12  ;;  %v330_v11 = vmul.f32 %v326_v9, %v1743_v13 }
 0x1d6   :  { %v1586_v16 = vpop.eup %1585 }
 0x1d7   :  { %v333_v17 = vadd.f32 %v330_v11, %v329_v10  ;;  %v327_v18 = vmul.f32 %v1586_v16, %v1576_v46  ;;  %v328_v19 = vmul.f32 %v1586_v16, %v1578_v48 }
 0x1d9   :  { %334 = vadd.xlane.f32.xlu1 %v333_v17  ;;  %v331_v20 = vmul.f32 %v327_v18, %v1748_v14  ;;  %v332_v21 = vmul.f32 %v328_v19, %v1753_v15 }
 0x1db   :  { %v336_v22 = vadd.f32 %v332_v21, %v331_v20 }
 0x1dd   :  { %337 = vadd.xlane.f32.xlu1 %v336_v22 }
 0x25e   :  { %v108_v23 = vpop.xlane.xlu1 %107 }
 0x25f   :  { %v112_v24 = vmul.f32 %v108_v23, %v1707_v1 }
 0x261   :  { %v115_v25 = vsel %vm114_vm0, %v112_v24, 0.0 }
 0x262   :  { %v116_v26 = vrot.slane %v115_v25, 4  ;;  %v111_v27 = vpop.xlane.xlu1 %110 }
 0x263   :  { %v113_v28 = vmul.f32 %v111_v27, %v1707_v1 }
 0x264   :  { %v117_v29 = vadd.f32 %v116_v26, %v115_v25 }
 0x265   :  { %v122_v30 = vsel %vm114_vm0, %v113_v28, 0.0 }
 0x266   :  { %v118_v31 = vrot.slane %v117_v29, 2  ;;  %v123_v32 = vrot.slane %v122_v30, 4  ;;  %v335_v33 = vpop.xlane.xlu1 %334 }
 0x267   :  { %v339_v34 = vmul.f32 %v335_v33, %v1707_v1 }
 0x268   :  { %v124_v35 = vadd.f32 %v123_v32, %v122_v30  ;;  %v119_v36 = vadd.f32 %v118_v31, %v117_v29 }
 0x269   :  { %v342_v37 = vsel %vm341_vm1, %v339_v34, 0.0  ;;  %v38_v34 = vld [vmem:[%s2847_s4] sm:$0xf]  ;;  %s1649_s4 = smov 4  }
 0x26a   :  { %v125_v38 = vrot.slane %v124_v35, 2  ;;  %v343_v39 = vrot.slane %v342_v37, 4  ;;  %v338_v40 = vpop.xlane.xlu1 %337  ;;  %v120_v41 = vrot.slane %v119_v36, 1 }
 0x26b   :  { %v340_v42 = vmul.f32 %v338_v40, %v1707_v1 }
 0x26c   :  { %v344_v43 = vadd.f32 %v343_v39, %v342_v37  ;;  %v121_v44 = vadd.f32 %v120_v41, %v119_v36  ;;  %v126_v45 = vadd.f32 %v125_v38, %v124_v35  ;;  %v398_v35 = vrot.slane %v38_v34, 2 }
 0x26d   :  { %v349_v46 = vsel %vm341_vm1, %v340_v42, 0.0  ;;  %v404_v36 = vrot.slane %v38_v34, 3  ;;  %v179_v39 = vrot.slane %v38_v34, 1 }
 0x26e   :  { %v345_v47 = vrot.slane %v344_v43, 2  ;;  %v350_v48 = vrot.slane %v349_v46, 4  ;;  %131 = vrot.lane.b32.xlu0 %v121_v44, %s1645_s0  ;;  %v127_v49 = vrot.slane %v126_v45, 1 }
 0x270   :  { %v351_v50 = vadd.f32 %v350_v48, %v349_v46  ;;  %v128_v51 = vadd.f32 %v127_v49, %v126_v45  ;;  %v346_v52 = vadd.f32 %v345_v47, %v344_v43 }
 0x272   :  { %v352_v53 = vrot.slane %v351_v50, 2  ;;  %133 = vrot.lane.b32.xlu1 %v128_v51, %s1645_s0  ;;  %v347_v54 = vrot.slane %v346_v52, 1 }
 0x274   :  { %v348_v55 = vadd.f32 %v347_v54, %v346_v52  ;;  %v353_v56 = vadd.f32 %v352_v53, %v351_v50 }
 0x276   :  { %358 = vrot.lane.b32.xlu1 %v348_v55, %s1646_s21  ;;  %v354_v57 = vrot.slane %v353_v56, 1 }
 0x278   :  { %v355_v58 = vadd.f32 %v354_v57, %v353_v56  ;;  %v187_v57 = vlaneseq }
 0x27a   :  { %360 = vrot.lane.b32.xlu0 %v355_v58, %s1646_s21 }
 0x2e0   :  { %v132_v59 = vpop.permute.xlu0 %131 }
 0x2e1   :  { %v138_v60 = vsel %vm137_vm2, %v132_v59, 0.0 }
 0x2e2   :  { %139 = vadd.xlane.f32.xlu1 %v138_v60 }
 0x2e4   :  { %v134_v61 = vpop.permute.xlu1 %133 }
 0x2e5   :  { %v141_v62 = vsel %vm137_vm2, %v134_v61, 0.0 }
 0x2e6   :  { %142 = vadd.xlane.f32.xlu0 %v141_v62 }
 0x2e8   :  { %v359_v63 = vpop.permute.xlu1 %358 }
 0x2e9   :  { %v364_v0 = vsel %vm137_vm2, %v359_v63, 0.0 }
 0x2ea   :  { %365 = vadd.xlane.f32.xlu0 %v364_v0 }
 0x2ec   :  { %v361_v2 = vpop.permute.xlu0 %360 }
 0x2ed   :  { %v367_v7 = vsel %vm137_vm2, %v361_v2, 0.0  ;;  %v1797_v2 = vshrl.u32 %v187_v57, 7 }
 0x2ee   :  { %368 = vadd.xlane.f32.xlu1 %v367_v7 }
 0x36f   :  { %v140_v8 = vpop.xlane.xlu1 %139 }
 0x370   :  { %v145_v9 = vmul.f32 0.25, %v140_v8 }
 0x372   :  { %v147_v10 = vsub.f32 %v121_v44, %v145_v9 }
 0x373   :  { %v143_v11 = vpop.xlane.xlu0 %142 }
 0x374   :  { %v146_v16 = vmul.f32 0.25, %v143_v11  ;;  %v149_v17 = vmul.f32 %v147_v10, %v147_v10 }
 0x376   :  { %v148_v18 = vsub.f32 %v128_v51, %v146_v16  ;;  %153 = vrot.lane.b32.xlu0 %v149_v17, %s1645_s0 }
 0x377   :  { %v366_v19 = vpop.xlane.xlu0 %365 }
 0x378   :  { %v370_v20 = vmul.f32 0.25, %v366_v19  ;;  %v150_v21 = vmul.f32 %v148_v18, %v148_v18 }
 0x37a   :  { %v372_v22 = vsub.f32 %v348_v55, %v370_v20  ;;  %155 = vrot.lane.b32.xlu1 %v150_v21, %s1645_s0 }
 0x37b   :  { %v369_v23 = vpop.xlane.xlu1 %368 }
 0x37c   :  { %v371_v24 = vmul.f32 0.25, %v369_v23  ;;  %v374_v25 = vmul.f32 %v372_v22, %v372_v22 }
 0x37e   :  { %v1781_v26 = vsub.f32 %v355_v58, %v371_v24  ;;  %378 = vrot.lane.b32.xlu1 %v374_v25, %s1646_s21 }
 0x380   :  { %v375_v27 = vmul.f32 %v1781_v26, %v1781_v26 }
 0x382   :  { %380 = vrot.lane.b32.xlu0 %v375_v27, %s1646_s21 }
 0x3e8   :  { %v154_v28 = vpop.permute.xlu0 %153 }
 0x3e9   :  { %v159_v29 = vsel %vm137_vm2, %v154_v28, 0.0 }
 0x3ea   :  { %160 = vadd.xlane.f32.xlu1 %v159_v29 }
 0x3ec   :  { %v156_v30 = vpop.permute.xlu1 %155 }
 0x3ed   :  { %v162_v31 = vsel %vm137_vm2, %v156_v30, 0.0 }
 0x3ee   :  { %163 = vadd.xlane.f32.xlu0 %v162_v31 }
 0x3f0   :  { %v379_v32 = vpop.permute.xlu1 %378 }
 0x3f1   :  { %v384_v33 = vsel %vm137_vm2, %v379_v32, 0.0 }
 0x3f2   :  { %385 = vadd.xlane.f32.xlu0 %v384_v33 }
 0x3f4   :  { %v381_v37 = vpop.permute.xlu0 %380 }
 0x3f5   :  { %v387_v38 = vsel %vm137_vm2, %v381_v37, 0.0 }
 0x3fb   :  { %399 = vrot.lane.b32.xlu1 %v398_v35, %s1647_s24 }
 0x408   :  { %174 = vrot.lane.b32.xlu0 %v38_v34, %s1648_s25 }
 0x40c   :  { %405 = vrot.lane.b32.xlu0 %v404_v36, %s1647_s24 }
 0x41f   :  { %388 = vadd.xlane.f32.xlu1 %v387_v38 }
 0x430   :  { %180 = vrot.lane.b32.xlu1 %v179_v39, %s1648_s25 }
 0x477   :  { %v161_v42 = vpop.xlane.xlu1 %160 }
 0x478   :  { %v165_v44 = vmul.f32 0.25, %v161_v42 }
 0x47a   :  { %v167_v47 = vadd.f32 1e-05, %v165_v44 }
 0x47b   :  { %v164_v40 = vpop.xlane.xlu0 %163  ;;  %v400_v52 = vpop.permute.xlu1 %399 }
 0x47c   :  { %v166_v45 = vmul.f32 0.25, %v164_v40 }
 0x47e   :  { %v168_v48 = vadd.f32 1e-05, %v166_v45 }
 0x47f   :  { %v386_v41 = vpop.xlane.xlu0 %385 }
 0x480   :  { %v390_v43 = vmul.f32 0.25, %v386_v41 }
 0x482   :  { %v392_v46 = vadd.f32 1e-05, %v390_v43 }
 0x483   :  { %v175_v54 = vpop.permute.xlu0 %174 }
 0x484   :  { %1587 = vrsqrt.f32 %v392_v46 }
 0x485   :  { %1589 = vrsqrt.f32 %v167_v47 }
 0x486   :  { %1591 = vrsqrt.f32 %v168_v48 }
 0x487   :  { %v406_v61 = vpop.permute.xlu0 %405 }
 0x48e   :  { %v1588_v49 = vpop.eup %1587 }
 0x48f   :  { %v1590_v50 = vpop.eup %1589  ;;  %v396_v53 = vmul.f32 %v1588_v49, %v372_v22 }
 0x490   :  { %v1592_v51 = vpop.eup %1591  ;;  %v171_v56 = vmul.f32 %v1590_v50, %v147_v10  ;;  %v1800_v10 = vsub.s32 0, %v1797_v2 }
 0x491   :  { %v172_v55 = vmul.f32 %v1592_v51, %v148_v18  ;;  %v402_v59 = vmul.f32 %v400_v52, %v396_v53 }
 0x492   :  { %v177_v62 = vmul.f32 %v175_v54, %v171_v56 }
 0x493   :  { %v178_v63 = vmul.f32 %v175_v54, %v172_v55  ;;  %v408_v8 = vadd.f32 %v406_v61, %v402_v59 }
 0x495   :  { %v410_v18 = vmax.f32 %v408_v8, 0.0 }
 0x497   :  { %v415_v21 = vrot.slane %v410_v18, %v1800_v10 }
 0x4ac   :  { %v389_v58 = vpop.xlane.xlu1 %388 }
 0x4ad   :  { %v391_v60 = vmul.f32 0.25, %v389_v58 }
 0x4af   :  { %v393_v0 = vadd.f32 1e-05, %v391_v60 }
 0x4b0   :  { %v181_v7 = vpop.permute.xlu1 %180 }
 0x4b1   :  { %1593 = vrsqrt.f32 %v393_v0  ;;  %v183_v9 = vadd.f32 %v181_v7, %v177_v62  ;;  %v184_v11 = vadd.f32 %v181_v7, %v178_v63 }
 0x4b3   :  { %v185_v16 = vmax.f32 %v183_v9, 0.0  ;;  %v186_v17 = vmax.f32 %v184_v11, 0.0 }
 0x4b5   :  { %v194_v19 = vrot.slane %v186_v17, %v1800_v10  ;;  %v190_v20 = vrot.slane %v185_v16, %v1800_v10 }
 0x4b7   :  { %199 = vrot.lane.b32.xlu0 %v194_v19, %s1649_s4  ;;  %197 = vrot.lane.b32.xlu1 %v190_v20, %s1649_s4 }
 0x4bb   :  { %v1594_v22 = vpop.eup %1593  ;;  %422 = vrot.lane.b32.xlu1 %v415_v21, %s1649_s4 }
 0x4bc   :  { %v397_v23 = vmul.f32 %v1594_v22, %v1781_v26 }
 0x4be   :  { %v403_v24 = vmul.f32 %v400_v52, %v397_v23 }
 0x4c0   :  { %v409_v25 = vadd.f32 %v406_v61, %v403_v24 }
 0x4c2   :  { %v411_v27 = vmax.f32 %v409_v25, 0.0 }
 0x4c4   :  { %v419_v28 = vrot.slane %v411_v27, %v1800_v10 }
 0x4c6   :  { %424 = vrot.lane.b32.xlu0 %v419_v28, %s1649_s4 }
 0x529   :  { %v200_v29 = vpop.permute.xlu0 %199  ;;  %v198_v30 = vpop.permute.xlu1 %197 }
 0x52a   :  { %v204_v31 = vmul.f32 %v200_v29, %v1707_v1  ;;  %v203_v32 = vmul.f32 %v198_v30, %v1707_v1 }
 0x52c   :  { %209 = vrot.lane.b32.xlu0 %v204_v31, %s1650_s26  ;;  %207 = vrot.lane.b32.xlu1 %v203_v32, %s1650_s26 }
 0x52d   :  { %v423_v33 = vpop.permute.xlu1 %422 }
 0x52e   :  { %v428_v34 = vmul.f32 %v423_v33, %v1707_v1 }
 0x530   :  { %432 = vrot.lane.b32.xlu1 %v428_v34, %s1651_s27 }
 0x538   :  { %v425_v26 = vpop.permute.xlu0 %424 }
 0x539   :  { %v429_v35 = vmul.f32 %v425_v26, %v1707_v1 }
 0x53b   :  { %434 = vrot.lane.b32.xlu0 %v429_v35, %s1651_s27 }
 0x59e   :  { %v210_v36 = vpop.permute.xlu0 %209  ;;  %v208_v37 = vpop.permute.xlu1 %207 }
 0x59f   :  { %v216_v38 = vsel %vm137_vm2, %v210_v36, 0.0  ;;  %v213_v39 = vsel %vm137_vm2, %v208_v37, 0.0 }
 0x5a0   :  { %217 = vadd.xlane.f32.xlu0 %v216_v38  ;;  %214 = vadd.xlane.f32.xlu1 %v213_v39 }
 0x5a2   :  { %v433_v40 = vpop.permute.xlu1 %432 }
 0x5a3   :  { %v438_v41 = vsel %vm137_vm2, %v433_v40, 0.0 }
 0x5a4   :  { %439 = vadd.xlane.f32.xlu0 %v438_v41 }
 0x5ad   :  { %v435_v42 = vpop.permute.xlu0 %434 }
 0x5ae   :  { %v441_v43 = vsel %vm137_vm2, %v435_v42, 0.0 }
 0x5af   :  { %442 = vadd.xlane.f32.xlu1 %v441_v43 }
 0x62d   :  { %v218_v44 = vpop.xlane.xlu0 %217  ;;  %v215_v45 = vpop.xlane.xlu1 %214 }
 0x62e   :  { %v1511_v1 = vmul.f32 -1.442695, %v218_v44  ;;  %v1510_v46 = vmul.f32 -1.442695, %v215_v45 }
 0x630   :  { %1595 = vpow2.f32 %v1511_v1 }
 0x631   :  { %1597 = vpow2.f32 %v1510_v46  ;;  %v440_v47 = vpop.xlane.xlu0 %439 }
 0x632   :  { %v1516_v48 = vmul.f32 -1.442695, %v440_v47 }
 0x634   :  { %1599 = vpow2.f32 %v1516_v48 }
 0x63a   :  { %v1596_v49 = vpop.eup %1595 }
 0x63b   :  { %v1598_v50 = vpop.eup %1597  ;;  %v226_v51 = vadd.f32 1.0, %v1596_v49 }
 0x63c   :  { %v225_v52 = vadd.f32 1.0, %v1598_v50  ;;  %v443_v53 = vpop.xlane.xlu1 %442 }
 0x63d   :  { %1601 = vrcp.f32 %v226_v51  ;;  %v1517_v54 = vmul.f32 -1.442695, %v443_v53 }
 0x63e   :  { %v1600_v55 = vpop.eup %1599  ;;  %1603 = vrcp.f32 %v225_v52 }
 0x63f   :  { %v450_v56 = vadd.f32 1.0, %v1600_v55  ;;  %1605 = vpow2.f32 %v1517_v54 }
 0x641   :  { %1607 = vrcp.f32 %v450_v56 }
 0x647   :  { %v1602_v58 = vpop.eup %1601 }
 0x648   :  { %v1604_v59 = vpop.eup %1603  ;;  %v233_v60 = vmul.f32 %v1602_v58, %v1714_v3  ;;  %v234_v61 = vmul.f32 %v1602_v58, %v1719_v4 }
 0x649   :  { %v231_v62 = vmul.f32 %v1604_v59, %v1724_v5  ;;  %v232_v63 = vmul.f32 %v1604_v59, %v1729_v6  ;;  %v1606_v0 = vpop.eup %1605 }
 0x64a   :  { %v1514_v7 = vmul.f32 -1.442695, %v233_v60  ;;  %494 = vst [vmem:[%s2848_s8 + $0x10] sm:$0xff] %v233_v60  ;;  %495 = vst [vmem:[%s2848_s8 + $0x18] sm:$0xff] %v234_v61  ;;  %v451_v20 = vadd.f32 1.0, %v1606_v0 }
 0x64b   :  { %v1608_v8 = vpop.eup %1607  ;;  %v1512_v9 = vmul.f32 -1.442695, %v231_v62  ;;  %v1513_v11 = vmul.f32 -1.442695, %v232_v63  ;;  %492 = vst [vmem:[%s2848_s8] sm:$0xff] %v231_v62  ;;  %493 = vst [vmem:[%s2848_s8 + $0x8] sm:$0xff] %v232_v63  ;;  %s1652_s8 = smov 17  }
 0x64c   :  { %v456_v16 = vmul.f32 %v1608_v8, %v1738_v12  ;;  %v457_v17 = vmul.f32 %v1608_v8, %v1743_v13  ;;  %1609 = vpow2.f32 %v1514_v7  ;;  %v1515_v21 = vmul.f32 -1.442695, %v234_v61 }
 0x64d   :  { %1611 = vpow2.f32 %v1512_v9 }
 0x64e   :  { %v1518_v18 = vmul.f32 -1.442695, %v456_v16  ;;  %v1519_v19 = vmul.f32 -1.442695, %v457_v17  ;;  %1613 = vpow2.f32 %v1513_v11 }
 0x650   :  { %1615 = vpow2.f32 %v1518_v18  ;;  %v1560_v18 = vld [vmem:[%s2850_s5 + $0x4] ss:$8 sps:$4 sm:$0xff]  }
 0x651   :  { %1617 = vpow2.f32 %v1519_v19  ;;  %1528 = vmatprep.mubr.msk.bf16.mxu0 %vm949_vm4, %v1560_v18  ;;  %1529 = vmatprep.mubr.msk.bf16.mxu1 %vm949_vm4, %v1560_v18 }
 0x652   :  { %1619 = vrcp.f32 %v451_v20 }
 0x653   :  { %1621 = vpow2.f32 %v1515_v21  ;;  %v2020_v21 = vld [vmem:[%s2849_s2] sm:$0xff] }
 0x656   :  { %v1610_v22 = vpop.eup %1609 }
 0x657   :  { %v1612_v23 = vpop.eup %1611  ;;  %v249_v32 = vadd.f32 1.0, %v1610_v22  ;;  %v2025_v22 = vld [vmem:[%s2849_s2 + $0x18] sm:$0xff] }
 0x658   :  { %v1614_v24 = vpop.eup %1613  ;;  %v247_v25 = vadd.f32 1.0, %v1612_v23  ;;  %v507_v23 = vld [vmem:[%s2851_s6] sm:$0xff] }
 0x659   :  { %v248_v28 = vadd.f32 1.0, %v1614_v24 }
 0x65a   :  { %v1616_v27 = vpop.eup %1615  ;;  %1623 = vrcp.f32 %v247_v25  ;;  %v2033_v25 = vld [vmem:[%s2849_s2 + $0x10] sm:$0xff] }
 0x65b   :  { %v1618_v29 = vpop.eup %1617  ;;  %v472_v30 = vadd.f32 1.0, %v1616_v27  ;;  %1625 = vrcp.f32 %v248_v28  ;;  %v2041_v28 = vrot.slane %v2020_v21, %v1800_v10 }
 0x65c   :  { %v1620_v31 = vpop.eup %1619  ;;  %v473_v33 = vadd.f32 1.0, %v1618_v29  ;;  %v2045_v29 = vrot.slane %v2025_v22, %v1800_v10 }
 0x65d   :  { %1627 = vrcp.f32 %v472_v30  ;;  %v458_v34 = vmul.f32 %v1620_v31, %v1748_v14  ;;  %v459_v26 = vmul.f32 %v1620_v31, %v1753_v15  ;;  %v1622_v35 = vpop.eup %1621 }
 0x65e   :  { %1629 = vrcp.f32 %v473_v33  ;;  %v250_v38 = vadd.f32 1.0, %v1622_v35  ;;  %v2053_v33 = vrot.slane %v2033_v25, %v1800_v10  ;;  %v1658_v35 = vmov 1  }
 0x65f   :  { %v1520_v36 = vmul.f32 -1.442695, %v458_v34  ;;  %v1521_v37 = vmul.f32 -1.442695, %v459_v26  ;;  %1631 = vrcp.f32 %v249_v32 }
 0x661   :  { %1633 = vpow2.f32 %v1520_v36 }
 0x662   :  { %1635 = vpow2.f32 %v1521_v37  ;;  %v592_v37 = vsub.s32 1, %v1797_v2 }
 0x663   :  { %1637 = vrcp.f32 %v250_v38 }
 0x664   :  { %v1624_v39 = vpop.eup %1623 }
 0x665   :  { %v1626_v40 = vpop.eup %1625  ;;  %v259_v41 = vmul.f32 %v1624_v39, %v1738_v12 }
 0x666   :  { %v260_v47 = vmul.f32 %v1626_v40, %v1743_v13 }
 0x667   :  { %v1628_v42 = vpop.eup %1627  ;;  %v1837_v44 = vadd.f32 %v259_v41, %v1738_v12 }
 0x668   :  { %v1630_v43 = vpop.eup %1629  ;;  %v484_v45 = vmul.f32 %v1628_v42, %v1724_v5  ;;  %v1854_v54 = vadd.f32 %v260_v47, %v1743_v13 }
 0x669   :  { %v485_v1 = vmul.f32 %v1630_v43, %v1729_v6  ;;  %v1632_v46 = vpop.eup %1631  ;;  %510 = vrot.lane.b32.xlu0 %v1837_v44, %s1652_s8 }
 0x66a   :  { %v1843_v48 = vadd.f32 %v484_v45, %v1724_v5  ;;  %v261_v53 = vmul.f32 %v1632_v46, %v1748_v14 }
 0x66b   :  { %v1634_v49 = vpop.eup %1633  ;;  %v1848_v50 = vadd.f32 %v485_v1, %v1729_v6 }
 0x66c   :  { %v1636_v12 = vpop.eup %1635  ;;  %v474_v51 = vadd.f32 1.0, %v1634_v49  ;;  %512 = vrot.lane.b32.xlu1 %v1843_v48, %s1652_s8  ;;  %v1862_v55 = vadd.f32 %v261_v53, %v1748_v14 }
 0x66d   :  { %v475_v52 = vadd.f32 1.0, %v1636_v12  ;;  %516 = vrot.lane.b32.xlu0 %v1848_v50, %s1652_s8  ;;  %v1638_v5 = vpop.eup %1637 }
 0x66e   :  { %1639 = vrcp.f32 %v474_v51  ;;  %v262_v6 = vmul.f32 %v1638_v5, %v1753_v15 }
 0x66f   :  { %1641 = vrcp.f32 %v475_v52 }
 0x670   :  { %514 = vrot.lane.b32.xlu1 %v1854_v54, %s1652_s8  ;;  %v1867_v13 = vadd.f32 %v262_v6, %v1753_v15  ;;  %v1985_v15 = vld [vmem:[%s2849_s2 + $0x8] sm:$0xff] }
 0x671   :  { %v2074_v51 = vrot.slane %v1985_v15, %v592_v37 }
 0x674   :  { %518 = vrot.lane.b32.xlu1 %v1862_v55, %s1652_s8 }
 0x678   :  { %v1640_v56 = vpop.eup %1639  ;;  %522 = vrot.lane.b32.xlu1 %v1867_v13, %s1652_s8 }
 0x679   :  { %v1642_v58 = vpop.eup %1641  ;;  %v486_v59 = vmul.f32 %v1640_v56, %v1714_v3 }
 0x67a   :  { %v487_v60 = vmul.f32 %v1642_v58, %v1719_v4 }
 0x67b   :  { %v1874_v61 = vadd.f32 %v486_v59, %v1714_v3  ;;  %v1976_v3 = vand.u32 127, %v187_v57  ;;  %v1992_v57 = vrot.slane %v1985_v15, %v1800_v10  ;;  %v508_v10 = vld [vmem:[%s2851_s6 + $0x8] sm:$0xff] }
 0x67c   :  { %565 = vrot.lane.b32.xlu1 %v1837_v44, %s1653_s13  ;;  %v1881_v14 = vadd.f32 %v487_v60, %v1719_v4 }
 0x67d   :  { %520 = vrot.lane.b32.xlu0 %v1874_v61, %s1652_s8  ;;  %vm528_vm3 = vcmp.lt.s32.totalorder %v1976_v3, 17  ;;  %vm581_vm5 = vcmp.lt.s32.totalorder %v1976_v3, 16  ;;  %vm634_vm6 = vcmp.lt.s32.totalorder %v1976_v3, 15  ;;  %vm687_vm7 = vcmp.lt.s32.totalorder %v1976_v3, 1 }
 0x67e   :  { %vm744_vm8 = vcmp.lt.s32.totalorder %v1976_v3, 127  ;;  %vm797_vm9 = vcmp.lt.s32.totalorder %v1976_v3, 113  ;;  %vm850_vm10 = vcmp.lt.s32.totalorder %v1976_v3, 112  ;;  %vm903_vm11 = vcmp.lt.s32.totalorder %v1976_v3, 111 }
 0x680   :  { %569 = vrot.lane.b32.xlu1 %v1854_v54, %s1653_s13 }
 0x681   :  { %524 = vrot.lane.b32.xlu0 %v1881_v14, %s1652_s8 }
 0x684   :  { %573 = vrot.lane.b32.xlu1 %v1862_v55, %s1653_s13 }
 0x685   :  { %567 = vrot.lane.b32.xlu0 %v1843_v48, %s1653_s13 }
 0x688   :  { %577 = vrot.lane.b32.xlu1 %v1867_v13, %s1653_s13 }
 0x689   :  { %571 = vrot.lane.b32.xlu0 %v1848_v50, %s1653_s13 }
 0x68c   :  { %618 = vrot.lane.b32.xlu1 %v1837_v44, %s1654_s14 }
 0x68d   :  { %575 = vrot.lane.b32.xlu0 %v1874_v61, %s1653_s13 }
 0x690   :  { %622 = vrot.lane.b32.xlu1 %v1854_v54, %s1654_s14 }
 0x691   :  { %579 = vrot.lane.b32.xlu0 %v1881_v14, %s1653_s13 }
 0x694   :  { %626 = vrot.lane.b32.xlu1 %v1862_v55, %s1654_s14 }
 0x695   :  { %620 = vrot.lane.b32.xlu0 %v1843_v48, %s1654_s14 }
 0x698   :  { %630 = vrot.lane.b32.xlu1 %v1867_v13, %s1654_s14 }
 0x699   :  { %624 = vrot.lane.b32.xlu0 %v1848_v50, %s1654_s14 }
 0x69c   :  { %671 = vrot.lane.b32.xlu1 %v1837_v44, %s1648_s25 }
 0x69d   :  { %628 = vrot.lane.b32.xlu0 %v1874_v61, %s1654_s14 }
 0x6a0   :  { %675 = vrot.lane.b32.xlu1 %v1854_v54, %s1648_s25 }
 0x6a1   :  { %632 = vrot.lane.b32.xlu0 %v1881_v14, %s1654_s14 }
 0x6a4   :  { %679 = vrot.lane.b32.xlu1 %v1862_v55, %s1648_s25 }
 0x6a5   :  { %673 = vrot.lane.b32.xlu0 %v1843_v48, %s1648_s25 }
 0x6a8   :  { %683 = vrot.lane.b32.xlu1 %v1867_v13, %s1648_s25 }
 0x6a9   :  { %677 = vrot.lane.b32.xlu0 %v1848_v50, %s1648_s25 }
 0x6ac   :  { %728 = vrot.lane.b32.xlu1 %v1837_v44, %s1645_s0 }
 0x6ad   :  { %681 = vrot.lane.b32.xlu0 %v1874_v61, %s1648_s25 }
 0x6b0   :  { %732 = vrot.lane.b32.xlu1 %v1854_v54, %s1645_s0 }
 0x6b1   :  { %685 = vrot.lane.b32.xlu0 %v1881_v14, %s1648_s25 }
 0x6b4   :  { %736 = vrot.lane.b32.xlu1 %v1862_v55, %s1645_s0 }
 0x6b5   :  { %730 = vrot.lane.b32.xlu0 %v1843_v48, %s1645_s0 }
 0x6b8   :  { %740 = vrot.lane.b32.xlu1 %v1867_v13, %s1645_s0 }
 0x6b9   :  { %734 = vrot.lane.b32.xlu0 %v1848_v50, %s1645_s0 }
 0x6bc   :  { %781 = vrot.lane.b32.xlu1 %v1837_v44, %s1655_s15 }
 0x6bd   :  { %738 = vrot.lane.b32.xlu0 %v1874_v61, %s1645_s0 }
 0x6c0   :  { %785 = vrot.lane.b32.xlu1 %v1854_v54, %s1655_s15 }
 0x6c1   :  { %742 = vrot.lane.b32.xlu0 %v1881_v14, %s1645_s0 }
 0x6c4   :  { %789 = vrot.lane.b32.xlu1 %v1862_v55, %s1655_s15 }
 0x6c5   :  { %783 = vrot.lane.b32.xlu0 %v1843_v48, %s1655_s15 }
 0x6c8   :  { %793 = vrot.lane.b32.xlu1 %v1867_v13, %s1655_s15 }
 0x6c9   :  { %787 = vrot.lane.b32.xlu0 %v1848_v50, %s1655_s15 }
 0x6cc   :  { %834 = vrot.lane.b32.xlu1 %v1837_v44, %s1656_s16 }
 0x6cd   :  { %791 = vrot.lane.b32.xlu0 %v1874_v61, %s1655_s15 }
 0x6d0   :  { %838 = vrot.lane.b32.xlu1 %v1854_v54, %s1656_s16 }
 0x6d1   :  { %795 = vrot.lane.b32.xlu0 %v1881_v14, %s1655_s15 }
 0x6d4   :  { %842 = vrot.lane.b32.xlu1 %v1862_v55, %s1656_s16 }
 0x6d5   :  { %836 = vrot.lane.b32.xlu0 %v1843_v48, %s1656_s16 }
 0x6d8   :  { %846 = vrot.lane.b32.xlu1 %v1867_v13, %s1656_s16 }
 0x6d9   :  { %840 = vrot.lane.b32.xlu0 %v1848_v50, %s1656_s16 }
 0x6db   :  { %v511_v4 = vpop.permute.xlu0 %510 }
 0x6dc   :  { %887 = vrot.lane.b32.xlu1 %v1837_v44, %s1657_s17 }
 0x6dd   :  { %844 = vrot.lane.b32.xlu0 %v1874_v61, %s1656_s16 }
 0x6de   :  { %v513_v62 = vpop.permute.xlu1 %512 }
 0x6df   :  { %v517_v63 = vpop.permute.xlu0 %516 }
 0x6e0   :  { %891 = vrot.lane.b32.xlu1 %v1854_v54, %s1657_s17  ;;  %v534_v0 = vsel %vm528_vm3, %v513_v62, %v517_v63 }
 0x6e1   :  { %848 = vrot.lane.b32.xlu0 %v1881_v14, %s1656_s16  ;;  %v558_v11 = vmul.f32 %v1992_v57, %v534_v0  ;;  %v2088_v0 = vrot.slane %v2025_v22, %v592_v37 }
 0x6e2   :  { %v515_v7 = vpop.permute.xlu1 %514 }
 0x6e3   :  { %v533_v8 = vsel %vm528_vm3, %v511_v4, %v515_v7 }
 0x6e4   :  { %895 = vrot.lane.b32.xlu1 %v1862_v55, %s1657_s17  ;;  %v554_v9 = vmul.f32 %v1992_v57, %v533_v8 }
 0x6e5   :  { %889 = vrot.lane.b32.xlu0 %v1843_v48, %s1657_s17 }
 0x6e6   :  { %v519_v16 = vpop.permute.xlu1 %518  ;;  %v562_v17 = vpack.c.bf16 %v558_v11, %v554_v9 }
 0x6e7   :  { %v531_v34 = vsel %vm528_vm3, %v515_v7, %v519_v16  ;;  %v2091_v7 = vrot.slane %v2033_v25, %v592_v37 }
 0x6e8   :  { %899 = vrot.lane.b32.xlu1 %v1867_v13, %s1657_s17  ;;  %953 = vmatprep.subr.bf16.mxu0 %v562_v17  ;;  %v555_v45 = vmul.f32 %v2053_v33, %v531_v34 }
 0x6e9   :  { %893 = vrot.lane.b32.xlu0 %v1848_v50, %s1657_s17 }
 0x6ea   :  { %v523_v19 = vpop.permute.xlu1 %522 }
 0x6eb   :  { %v535_v30 = vsel %vm528_vm3, %v523_v19, %v511_v4  ;;  %v529_v32 = vsel %vm528_vm3, %v519_v16, %v523_v19 }
 0x6ec   :  { %1041 = vperm.xlu1 %1554, %v507_v23   ;;  %v553_v40 = vmul.f32 %v2041_v28, %v535_v30  ;;  %v556_v42 = vmul.f32 %v2045_v29, %v529_v32 }
 0x6ed   :  { %897 = vrot.lane.b32.xlu0 %v1874_v61, %s1657_s17 }
 0x6ee   :  { %v566_v20 = vpop.permute.xlu1 %565 }
 0x6ef   :  { %v521_v24 = vpop.permute.xlu0 %520 }
 0x6f0   :  { %v532_v27 = vsel %vm528_vm3, %v517_v63, %v521_v24  ;;  %1556 = vset.pattern.permute.xlu1 %v1658_v35  ;;  %v2085_v63 = vrot.slane %v2020_v21, %v592_v37 }
 0x6f1   :  { %901 = vrot.lane.b32.xlu0 %v1881_v14, %s1657_s17  ;;  %v559_v39 = vmul.f32 %v2053_v33, %v532_v27  ;;  %1058 = vperm.xlu1 %1556, %v507_v23  }
 0x6f2   :  { %v570_v31 = vpop.permute.xlu1 %569 }
 0x6f3   :  { %v525_v26 = vpop.permute.xlu0 %524  ;;  %v563_v12 = vpack.c.bf16 %v559_v39, %v555_v45  ;;  %v586_v52 = vsel %vm581_vm5, %v566_v20, %v570_v31 }
 0x6f4   :  { %v536_v36 = vsel %vm528_vm3, %v525_v26, %v513_v62  ;;  %v530_v38 = vsel %vm528_vm3, %v521_v24, %v525_v26  ;;  %v607_v56 = vmul.f32 %v2074_v51, %v586_v52  ;;  %v645_v24 = vsub.s32 2, %v1797_v2 }
 0x6f5   :  { %v557_v41 = vmul.f32 %v2041_v28, %v536_v36  ;;  %v560_v43 = vmul.f32 %v2045_v29, %v530_v38  ;;  %1046 = vperm.xlu0 %1555, %v508_v10   ;;  %1062 = vperm.xlu1 %1556, %v508_v10  }
 0x6f6   :  { %v574_v1 = vpop.permute.xlu1 %573  ;;  %v2112_v39 = vrot.slane %v1985_v15, %v645_v24  ;;  %v2126_v52 = vrot.slane %v2025_v22, %v645_v24 }
 0x6f7   :  { %v568_v46 = vpop.permute.xlu0 %567  ;;  %v561_v47 = vpack.c.bf16 %v557_v41, %v553_v40  ;;  %v564_v49 = vpack.c.bf16 %v560_v43, %v556_v42  ;;  %v584_v16 = vsel %vm581_vm5, %v570_v31, %v574_v1 }
 0x6f8   :  { %v608_v31 = vmul.f32 %v2091_v7, %v584_v16 }
 0x6f9   :  { %954 = vmatpush1.bf16.msra.mxu0 %v561_v47  ;;  %996 = vmatprep.subr.bf16.mxu1 %v564_v49 }
 0x6fa   :  { %997 = vmatpush1.bf16.msra.mxu1 %v563_v12  ;;  %v578_v53 = vpop.permute.xlu1 %577  ;;  %v2123_v12 = vrot.slane %v2020_v21, %v645_v24 }
 0x6fb   :  { %v572_v5 = vpop.permute.xlu0 %571  ;;  %v582_v8 = vsel %vm581_vm5, %v574_v1, %v578_v53  ;;  %v588_v9 = vsel %vm581_vm5, %v578_v53, %v566_v20  ;;  %v2129_v53 = vrot.slane %v2033_v25, %v645_v24 }
 0x6fc   :  { %v587_v6 = vsel %vm581_vm5, %v568_v46, %v572_v5  ;;  %v606_v27 = vmul.f32 %v2085_v63, %v588_v9  ;;  %v609_v30 = vmul.f32 %v2088_v0, %v582_v8  ;;  %v698_v9 = vsub.s32 3, %v1797_v2 }
 0x6fd   :  { %v611_v58 = vmul.f32 %v2074_v51, %v587_v6 }
 0x6fe   :  { %v619_v59 = vpop.permute.xlu1 %618 }
 0x6ff   :  { %v576_v60 = vpop.permute.xlu0 %575  ;;  %v615_v4 = vpack.c.bf16 %v611_v58, %v607_v56 }
 0x700   :  { %v585_v62 = vsel %vm581_vm5, %v572_v5, %v576_v60 }
 0x701   :  { %955 = vmatprep.subr.bf16.mxu0 %v615_v4  ;;  %v612_v18 = vmul.f32 %v2091_v7, %v585_v62 }
 0x702   :  { %v623_v11 = vpop.permute.xlu1 %622 }
 0x703   :  { %v580_v17 = vpop.permute.xlu0 %579  ;;  %v616_v38 = vpack.c.bf16 %v612_v18, %v608_v31  ;;  %v639_v10 = vsel %vm634_vm6, %v619_v59, %v623_v11 }
 0x704   :  { %v583_v19 = vsel %vm581_vm5, %v576_v60, %v580_v17  ;;  %v589_v23 = vsel %vm581_vm5, %v580_v17, %v568_v46  ;;  %v660_v43 = vmul.f32 %v2112_v39, %v639_v10 }
 0x705   :  { %v610_v20 = vmul.f32 %v2085_v63, %v589_v23  ;;  %v613_v32 = vmul.f32 %v2088_v0, %v583_v19 }
 0x706   :  { %v627_v34 = vpop.permute.xlu1 %626 }
 0x707   :  { %v621_v26 = vpop.permute.xlu0 %620  ;;  %v614_v36 = vpack.c.bf16 %v610_v20, %v606_v27  ;;  %v617_v37 = vpack.c.bf16 %v613_v32, %v609_v30  ;;  %v637_v58 = vsel %vm634_vm6, %v623_v11, %v627_v34  ;;  %v2150_v20 = vrot.slane %v1985_v15, %v698_v9 }
 0x708   :  { %v661_v11 = vmul.f32 %v2129_v53, %v637_v58 }
 0x709   :  { %956 = vmatpush1.bf16.msra.mxu0 %v614_v36  ;;  %998 = vmatprep.subr.bf16.mxu1 %v617_v37 }
 0x70a   :  { %999 = vmatpush1.bf16.msra.mxu1 %v616_v38  ;;  %v631_v40 = vpop.permute.xlu1 %630 }
 0x70b   :  { %v625_v41 = vpop.permute.xlu0 %624  ;;  %v635_v5 = vsel %vm634_vm6, %v627_v34, %v631_v40  ;;  %v641_v6 = vsel %vm634_vm6, %v631_v40, %v619_v59 }
 0x70c   :  { %v640_v42 = vsel %vm634_vm6, %v621_v26, %v625_v41  ;;  %v659_v16 = vmul.f32 %v2123_v12, %v641_v6  ;;  %v662_v17 = vmul.f32 %v2126_v52, %v635_v5 }
 0x70d   :  { %v664_v45 = vmul.f32 %v2112_v39, %v640_v42  ;;  %v2161_v42 = vrot.slane %v2020_v21, %v698_v9 }
 0x70e   :  { %v672_v1 = vpop.permute.xlu1 %671 }
 0x70f   :  { %v629_v46 = vpop.permute.xlu0 %628  ;;  %v668_v47 = vpack.c.bf16 %v664_v45, %v660_v43  ;;  %v2164_v43 = vrot.slane %v2025_v22, %v698_v9  ;;  %v2167_v45 = vrot.slane %v2033_v25, %v698_v9 }
 0x710   :  { %v638_v49 = vsel %vm634_vm6, %v625_v41, %v629_v46 }
 0x711   :  { %957 = vmatprep.subr.bf16.mxu0 %v668_v47  ;;  %v665_v4 = vmul.f32 %v2129_v53, %v638_v49 }
 0x712   :  { %v676_v56 = vpop.permute.xlu1 %675 }
 0x713   :  { %v633_v60 = vpop.permute.xlu0 %632  ;;  %v669_v30 = vpack.c.bf16 %v665_v4, %v661_v11  ;;  %v692_v32 = vsel %vm687_vm7, %v672_v1, %v676_v56  ;;  %v725_v11 = vpack.c.bf16 %v1848_v50, %v1854_v54  ;;  %v726_v50 = vpack.c.bf16 %v1874_v61, %v1862_v55 }
 0x714   :  { %v636_v62 = vsel %vm634_vm6, %v629_v46, %v633_v60  ;;  %v642_v8 = vsel %vm634_vm6, %v633_v60, %v621_v26  ;;  %v713_v36 = vmul.f32 %v2150_v20, %v692_v32  ;;  %v724_v32 = vpack.c.bf16 %v1843_v48, %v1837_v44 }
 0x715   :  { %v663_v59 = vmul.f32 %v2123_v12, %v642_v8  ;;  %v666_v18 = vmul.f32 %v2126_v52, %v636_v62 }
 0x716   :  { %v680_v19 = vpop.permute.xlu1 %679 }
 0x717   :  { %v674_v23 = vpop.permute.xlu0 %673  ;;  %v667_v24 = vpack.c.bf16 %v663_v59, %v659_v16  ;;  %v670_v27 = vpack.c.bf16 %v666_v18, %v662_v17  ;;  %v690_v5 = vsel %vm687_vm7, %v676_v56, %v680_v19 }
 0x718   :  { %v714_v16 = vmul.f32 %v2167_v45, %v690_v5 }
 0x719   :  { %958 = vmatpush1.bf16.msra.mxu0 %v667_v24  ;;  %1000 = vmatprep.subr.bf16.mxu1 %v670_v27  ;;  %v755_v24 = vsub.s32 5, %v1797_v2 }
 0x71a   :  { %1001 = vmatpush1.bf16.msra.mxu1 %v669_v30  ;;  %v684_v31 = vpop.permute.xlu1 %683 }
 0x71b   :  { %v678_v34 = vpop.permute.xlu0 %677  ;;  %v688_v46 = vsel %vm687_vm7, %v680_v19, %v684_v31  ;;  %v694_v47 = vsel %vm687_vm7, %v684_v31, %v672_v1 }
 0x71c   :  { %v693_v26 = vsel %vm687_vm7, %v674_v23, %v678_v34  ;;  %v712_v62 = vmul.f32 %v2161_v42, %v694_v47  ;;  %v715_v8 = vmul.f32 %v2164_v43, %v688_v46 }
 0x71d   :  { %v717_v37 = vmul.f32 %v2150_v20, %v693_v26 }
 0x71e   :  { %v729_v38 = vpop.permute.xlu1 %728 }
 0x71f   :  { %v682_v10 = vpop.permute.xlu0 %681  ;;  %v721_v40 = vpack.c.bf16 %v717_v37, %v713_v36  ;;  %v2213_v37 = vrot.slane %v2033_v25, %v755_v24 }
 0x720   :  { %v691_v41 = vsel %vm687_vm7, %v678_v34, %v682_v10 }
 0x721   :  { %959 = vmatprep.subr.bf16.mxu0 %v721_v40  ;;  %v718_v58 = vmul.f32 %v2167_v45, %v691_v41 }
 0x722   :  { %v733_v49 = vpop.permute.xlu1 %732 }
 0x723   :  { %v686_v6 = vpop.permute.xlu0 %685  ;;  %v722_v19 = vpack.c.bf16 %v718_v58, %v714_v16  ;;  %v749_v48 = vsel %vm744_vm8, %v729_v38, %v733_v49 }
 0x724   :  { %v689_v60 = vsel %vm687_vm7, %v682_v10, %v686_v6  ;;  %v695_v4 = vsel %vm687_vm7, %v686_v6, %v674_v23  ;;  %v727_v23 = vpack.c.bf16 %v1881_v14, %v1867_v13  ;;  %v2198_v13 = vrot.slane %v1985_v15, %v755_v24 }
 0x725   :  { %v716_v9 = vmul.f32 %v2161_v42, %v695_v4  ;;  %v719_v1 = vmul.f32 %v2164_v43, %v689_v60  ;;  %v2201_v14 = vrot.slane %v2020_v21, %v755_v24  ;;  %v2216_v10 = vrot.slane %v2025_v22, %v755_v24 }
 0x726   :  { %v737_v56 = vpop.permute.xlu1 %736 }
 0x727   :  { %v731_v17 = vpop.permute.xlu0 %730  ;;  %v720_v59 = vpack.c.bf16 %v716_v9, %v712_v62  ;;  %v723_v18 = vpack.c.bf16 %v719_v1, %v715_v8  ;;  %v747_v31 = vsel %vm744_vm8, %v733_v49, %v737_v56  ;;  %v769_v40 = vmul.f32 %v2201_v14, %v749_v48 }
 0x728   :  { %v770_v26 = vmul.f32 %v2198_v13, %v747_v31 }
 0x729   :  { %960 = vmatpush1.bf16.msra.mxu0 %v720_v59  ;;  %1002 = vmatprep.subr.bf16.mxu1 %v723_v18  ;;  %v808_v59 = vsub.s32 6, %v1797_v2 }
 0x72a   :  { %961 = vmatprep.subr.bf16.mxu0 %v725_v11  ;;  %1003 = vmatpush1.bf16.msra.mxu1 %v722_v19  ;;  %v741_v27 = vpop.permute.xlu1 %740 }
 0x72b   :  { %v735_v30 = vpop.permute.xlu0 %734  ;;  %1004 = vmatprep.subr.bf16.mxu1 %v727_v23  ;;  %v745_v41 = vsel %vm744_vm8, %v737_v56, %v741_v27  ;;  %v751_v46 = vsel %vm744_vm8, %v741_v27, %v729_v38  ;;  %v2236_v19 = vrot.slane %v1985_v15, %v808_v59  ;;  %v2239_v23 = vrot.slane %v2020_v21, %v808_v59 }
 0x72c   :  { %v750_v54 = vsel %vm744_vm8, %v731_v17, %v735_v30  ;;  %v771_v4 = vmul.f32 %v2213_v37, %v745_v41  ;;  %v772_v62 = vmul.f32 %v2216_v10, %v751_v46 }
 0x72d   :  { %962 = vmatpush1.bf16.msra.mxu0 %v724_v32  ;;  %v773_v55 = vmul.f32 %v2201_v14, %v750_v54  ;;  %2890 = vst [vmem:[#allocation2_spill] sm:$0xff] %v2236_v19  ;;  %2891 = vst [vmem:[#allocation3_spill] sm:$0xff] %v2239_v23 }
 0x72e   :  { %1005 = vmatpush1.bf16.msra.mxu1 %v726_v50  ;;  %v782_v44 = vpop.permute.xlu1 %781 }
 0x72f   :  { %v739_v34 = vpop.permute.xlu0 %738  ;;  %v777_v60 = vpack.c.bf16 %v773_v55, %v769_v40  ;;  %v2254_v55 = vrot.slane %v2025_v22, %v808_v59 }
 0x730   :  { %v748_v61 = vsel %vm744_vm8, %v735_v30, %v739_v34 }
 0x731   :  { %v774_v36 = vmul.f32 %v2198_v13, %v748_v61  ;;  %2893 = vst [vmem:[#allocation5_spill] sm:$0xff] %v2254_v55 }
 0x732   :  { %v786_v47 = vpop.permute.xlu1 %785 }
 0x733   :  { %v743_v49 = vpop.permute.xlu0 %742  ;;  %v778_v5 = vpack.c.bf16 %v774_v36, %v770_v26  ;;  %v802_v30 = vsel %vm797_vm9, %v782_v44, %v786_v47 }
 0x734   :  { %v746_v6 = vsel %vm744_vm8, %v739_v34, %v743_v49  ;;  %v752_v58 = vsel %vm744_vm8, %v743_v49, %v731_v17  ;;  %v2251_v34 = vrot.slane %v2033_v25, %v808_v59  ;;  %v822_v61 = vmul.f32 %v2239_v23, %v802_v30 }
 0x735   :  { %v775_v8 = vmul.f32 %v2213_v37, %v746_v6  ;;  %v776_v9 = vmul.f32 %v2216_v10, %v752_v58  ;;  %963 = vmatprep.subr.bf16.mxu0 %v778_v5 }
 0x736   :  { %964 = vmatpush1.bf16.msra.mxu0 %v777_v60  ;;  %v790_v38 = vpop.permute.xlu1 %789  ;;  %2892 = vst [vmem:[#allocation4_spill] sm:$0xff] %v2251_v34 }
 0x737   :  { %v784_v1 = vpop.permute.xlu0 %783  ;;  %v780_v16 = vpack.c.bf16 %v776_v9, %v772_v62  ;;  %v779_v56 = vpack.c.bf16 %v775_v8, %v771_v4  ;;  %v800_v24 = vsel %vm797_vm9, %v786_v47, %v790_v38 }
 0x738   :  { %v823_v31 = vmul.f32 %v2236_v19, %v800_v24 }
 0x739   :  { %1006 = vmatprep.subr.bf16.mxu1 %v780_v16 }
 0x73a   :  { %1007 = vmatpush1.bf16.msra.mxu1 %v779_v56  ;;  %v794_v17 = vpop.permute.xlu1 %793 }
 0x73b   :  { %v788_v18 = vpop.permute.xlu0 %787  ;;  %v798_v26 = vsel %vm797_vm9, %v790_v38, %v794_v17  ;;  %v804_v36 = vsel %vm797_vm9, %v794_v17, %v782_v44  ;;  %v861_v38 = vsub.s32 7, %v1797_v2 }
 0x73c   :  { %v803_v11 = vsel %vm797_vm9, %v784_v1, %v788_v18  ;;  %v824_v6 = vmul.f32 %v2251_v34, %v798_v26  ;;  %v825_v58 = vmul.f32 %v2254_v55, %v804_v36 }
 0x73d   :  { %v826_v50 = vmul.f32 %v2239_v23, %v803_v11  ;;  %v2274_v59 = vrot.slane %v1985_v15, %v861_v38  ;;  %v2277_v17 = vrot.slane %v2020_v21, %v861_v38  ;;  %v2289_v21 = vrot.slane %v2033_v25, %v861_v38 }
 0x73e   :  { %v835_v27 = vpop.permute.xlu1 %834 }
 0x73f   :  { %v792_v32 = vpop.permute.xlu0 %791  ;;  %v830_v5 = vpack.c.bf16 %v826_v50, %v822_v61  ;;  %2894 = vst [vmem:[#allocation6_spill] sm:$0xff] %v2274_v59  ;;  %2895 = vst [vmem:[#allocation7_spill] sm:$0xff] %v2277_v17 }
 0x740   :  { %v801_v54 = vsel %vm797_vm9, %v788_v18, %v792_v32  ;;  %2896 = vst [vmem:[#allocation8_spill] sm:$0xff] %v2289_v21 }
 0x741   :  { %v827_v48 = vmul.f32 %v2236_v19, %v801_v54  ;;  %v2292_v54 = vrot.slane %v2025_v22, %v861_v38 }
 0x742   :  { %v839_v40 = vpop.permute.xlu1 %838 }
 0x743   :  { %v796_v41 = vpop.permute.xlu0 %795  ;;  %v831_v46 = vpack.c.bf16 %v827_v48, %v823_v31  ;;  %v855_v2 = vsel %vm850_vm10, %v835_v27, %v839_v40  ;;  %2897 = vst [vmem:[#allocation9_spill] sm:$0xff] %v2292_v54 }
 0x744   :  { %v799_v47 = vsel %vm797_vm9, %v792_v32, %v796_v41  ;;  %v805_v49 = vsel %vm797_vm9, %v796_v41, %v784_v1  ;;  %v875_v31 = vmul.f32 %v2277_v17, %v855_v2 }
 0x745   :  { %v828_v60 = vmul.f32 %v2251_v34, %v799_v47  ;;  %v829_v4 = vmul.f32 %v2254_v55, %v805_v49  ;;  %965 = vmatprep.subr.bf16.mxu0 %v831_v46 }
 0x746   :  { %966 = vmatpush1.bf16.msra.mxu0 %v830_v5  ;;  %v843_v44 = vpop.permute.xlu1 %842 }
 0x747   :  { %v837_v62 = vpop.permute.xlu0 %836  ;;  %v833_v8 = vpack.c.bf16 %v829_v4, %v825_v58  ;;  %v832_v9 = vpack.c.bf16 %v828_v60, %v824_v6  ;;  %v853_v18 = vsel %vm850_vm10, %v839_v40, %v843_v44 }
 0x748   :  { %v876_v50 = vmul.f32 %v2274_v59, %v853_v18 }
 0x749   :  { %1008 = vmatprep.subr.bf16.mxu1 %v833_v8 }
 0x74a   :  { %1009 = vmatpush1.bf16.msra.mxu1 %v832_v9  ;;  %v847_v1 = vpop.permute.xlu1 %846  ;;  %v2320_v9 = vld [vmem:[%s2849_s2 + $0x20] ss:$0 sm:$0xff] }
 0x74b   :  { %v841_v16 = vpop.permute.xlu0 %840  ;;  %v851_v48 = vsel %vm850_vm10, %v843_v44, %v847_v1  ;;  %v857_v61 = vsel %vm850_vm10, %v847_v1, %v835_v27  ;;  %2899 = vst [vmem:[#allocation11_spill] sm:$0xff] %v2320_v9 }
 0x74c   :  { %v856_v56 = vsel %vm850_vm10, %v837_v62, %v841_v16  ;;  %v877_v22 = vmul.f32 %v2289_v21, %v851_v48  ;;  %v878_v47 = vmul.f32 %v2292_v54, %v857_v61 }
 0x74d   :  { %v879_v30 = vmul.f32 %v2277_v17, %v856_v56 }
 0x74e   :  { %v888_v11 = vpop.permute.xlu1 %887 }
 0x74f   :  { %v845_v24 = vpop.permute.xlu0 %844  ;;  %v883_v46 = vpack.c.bf16 %v879_v30, %v875_v31 }
 0x750   :  { %v854_v32 = vsel %vm850_vm10, %v841_v16, %v845_v24 }
 0x751   :  { %v880_v15 = vmul.f32 %v2274_v59, %v854_v32  ;;  %v2333_v32 = vld [vmem:[%s2849_s2 + $0x30] ss:$0 sm:$0xff] }
 0x752   :  { %v892_v40 = vpop.permute.xlu1 %891  ;;  %2900 = vst [vmem:[#allocation12_spill] sm:$0xff] %v2333_v32 }
 0x753   :  { %v849_v26 = vpop.permute.xlu0 %848  ;;  %v884_v36 = vpack.c.bf16 %v880_v15, %v876_v50  ;;  %v908_v38 = vsel %vm903_vm11, %v888_v11, %v892_v40  ;;  %v2338_v50 = vld [vmem:[%s2849_s2 + $0x38] ss:$0 sm:$0xff] }
 0x754   :  { %v852_v41 = vsel %vm850_vm10, %v845_v24, %v849_v26  ;;  %v858_v25 = vsel %vm850_vm10, %v849_v26, %v837_v62  ;;  %v2313_v62 = vld [vmem:[%s2849_s2 + $0x28] ss:$0 sm:$0xff]  ;;  %v928_v30 = vmul.f32 %v2320_v9, %v908_v38  ;;  %2901 = vst [vmem:[#allocation13_spill] sm:$0xff] %v2338_v50 }
 0x755   :  { %v881_v49 = vmul.f32 %v2289_v21, %v852_v41  ;;  %v882_v5 = vmul.f32 %v2292_v54, %v858_v25  ;;  %967 = vmatprep.subr.bf16.mxu0 %v884_v36  ;;  %2898 = vst [vmem:[#allocation10_spill] sm:$0xff] %v2313_v62 }
 0x756   :  { %968 = vmatpush1.bf16.msra.mxu0 %v883_v46  ;;  %v896_v60 = vpop.permute.xlu1 %895 }
 0x757   :  { %v890_v27 = vpop.permute.xlu0 %889  ;;  %v886_v6 = vpack.c.bf16 %v882_v5, %v878_v47  ;;  %v885_v58 = vpack.c.bf16 %v881_v49, %v877_v22  ;;  %v906_v8 = vsel %vm903_vm11, %v892_v40, %v896_v60 }
 0x758   :  { %v929_v2 = vmul.f32 %v2313_v62, %v906_v8 }
 0x759   :  { %1010 = vmatprep.subr.bf16.mxu1 %v886_v6 }
 0x75a   :  { %1011 = vmatpush1.bf16.msra.mxu1 %v885_v58  ;;  %v900_v16 = vpop.permute.xlu1 %899 }
 0x75b   :  { %v894_v4 = vpop.permute.xlu0 %893  ;;  %v904_v15 = vsel %vm903_vm11, %v896_v60, %v900_v16  ;;  %v910_v31 = vsel %vm903_vm11, %v900_v16, %v888_v11  ;;  %v1558_v11 = vld [vmem:[%s2850_s5] ss:$8 sps:$4 sm:$0xff]  }
 0x75c   :  { %v909_v44 = vsel %vm903_vm11, %v890_v27, %v894_v4  ;;  %v930_v41 = vmul.f32 %v2333_v32, %v904_v15  ;;  %v931_v25 = vmul.f32 %v2338_v50, %v910_v31 }
 0x75d   :  { %v932_v56 = vmul.f32 %v2320_v9, %v909_v44 }
 0x75f   :  { %v898_v1 = vpop.permute.xlu0 %897  ;;  %v936_v40 = vpack.c.bf16 %v932_v56, %v928_v30 }
 0x760   :  { %v907_v18 = vsel %vm903_vm11, %v894_v4, %v898_v1 }
 0x761   :  { %v933_v24 = vmul.f32 %v2313_v62, %v907_v18 }
 0x763   :  { %v902_v48 = vpop.permute.xlu0 %901  ;;  %v937_v61 = vpack.c.bf16 %v933_v24, %v929_v2 }
 0x764   :  { %v905_v26 = vsel %vm903_vm11, %v898_v1, %v902_v48  ;;  %v911_v36 = vsel %vm903_vm11, %v902_v48, %v890_v27 }
 0x765   :  { %v934_v46 = vmul.f32 %v2333_v32, %v905_v26  ;;  %v935_v22 = vmul.f32 %v2338_v50, %v911_v36  ;;  %969 = vmatprep.subr.bf16.mxu0 %v937_v61 }
 0x766   :  { %970 = vmatpush1.bf16.msra.mxu0 %v936_v40 }
 0x767   :  { %v939_v47 = vpack.c.bf16 %v935_v22, %v931_v25  ;;  %v938_v49 = vpack.c.bf16 %v934_v46, %v930_v41 }
 0x769   :  { %986 = vmatmul.mubr.bf16.vlgmr.msra.gmra.mrb[0].mxu0 %v1558_v11  ;;  %1012 = vmatprep.subr.bf16.mxu1 %v939_v47 }
 0x76a   :  { %1013 = vmatpush1.bf16.msra.mxu1 %v938_v49 }
 0x76b   :  { %v1042_v5 = vpop.permute.xlu1 %1041 }
 0x76d   :  { %1029 = vmatmul.mubr.bf16.vlgmr.msra.gmra.mrb[0].mxu1 %v1558_v11 }
 0x770   :  { %v1059_v27 = vpop.permute.xlu1 %1058 }
 0x774   :  { %v1047_v58 = vpop.permute.xlu0 %1046  ;;  %v1063_v56 = vpop.permute.xlu1 %1062 }
 0x83c   :  { %v987_v6 = vpop.f32.mrb[0].mxu0 }
 0x83d   :  { %v1049_v60 = vmul.f32 %v1042_v5, %v987_v6  ;;  %v989_v4 = vpop.f32.mrb[1].mxu0 }
 0x83e   :  { %v1050_v44 = vmul.f32 %v1042_v5, %v989_v4  ;;  %v991_v8 = vpop.f32.mrb[2].mxu0 }
 0x83f   :  { %v1065_v38 = vadd.f32 %v1059_v27, %v1049_v60  ;;  %v1053_v1 = vmul.f32 %v1047_v58, %v991_v8  ;;  %v993_v16 = vpop.f32.mrb[3].mxu0 }
 0x840   :  { %v1066_v18 = vadd.f32 %v1059_v27, %v1050_v44  ;;  %v1054_v2 = vmul.f32 %v1047_v58, %v993_v16  ;;  %v1030_v24 = vpop.f32.mrb[0].mxu1 }
 0x841   :  { %v1069_v30 = vadd.f32 %v1063_v56, %v1053_v1  ;;  %v1051_v15 = vmul.f32 %v1042_v5, %v1030_v24  ;;  %v1032_v31 = vpop.f32.mrb[1].mxu1  ;;  %v1073_v36 = vmax.f32 %v1065_v38, 0.0 }
 0x842   :  { %v1070_v48 = vadd.f32 %v1063_v56, %v1054_v2  ;;  %v1052_v61 = vmul.f32 %v1042_v5, %v1032_v31  ;;  %v1034_v26 = vpop.f32.mrb[2].mxu1  ;;  %v1074_v22 = vmax.f32 %v1066_v18, 0.0 }
 0x843   :  { %v1077_v40 = vmax.f32 %v1069_v30, 0.0  ;;  %v1067_v41 = vadd.f32 %v1059_v27, %v1051_v15  ;;  %v1055_v25 = vmul.f32 %v1047_v58, %v1034_v26  ;;  %v1036_v46 = vpop.f32.mrb[3].mxu1  ;;  %v2492_v26 = vld [vmem:[%s2850_s5 + $0x10] sm:$0xff] }
 0x844   :  { %v1078_v11 = vmax.f32 %v1070_v48, 0.0  ;;  %v1068_v47 = vadd.f32 %v1059_v27, %v1052_v61  ;;  %v1056_v49 = vmul.f32 %v1047_v58, %v1036_v46  ;;  %2904 = vst [vmem:[#allocation16_spill] sm:$0xff] %v2492_v26 }
 0x845   :  { %v2355_v6 = vmax.f32 %v1073_v36, %v1077_v40  ;;  %v1085_v60 = vadd.f32 %v1077_v40, %v1073_v36  ;;  %v1071_v4 = vadd.f32 %v1063_v56, %v1055_v25  ;;  %v1075_v5 = vmax.f32 %v1067_v41, 0.0 }
 0x846   :  { %v2357_v44 = vmax.f32 %v1074_v22, %v1078_v11  ;;  %v1086_v8 = vadd.f32 %v1078_v11, %v1074_v22  ;;  %v1072_v1 = vadd.f32 %v1063_v56, %v1056_v49  ;;  %v1076_v2 = vmax.f32 %v1068_v47, 0.0  ;;  %v509_v47 = vld [vmem:[%s2851_s6 + $0x10] sm:$0xff] }
 0x847   :  { %v2359_v16 = vmul.f32 0.5, %v1085_v60  ;;  %v1079_v38 = vmax.f32 %v1071_v4, 0.0  ;;  %1093 = vrot.lane.b32.xlu0 %v2355_v6, %s1652_s8  ;;  %v1531_v41 = vcombine.high %v2492_v26, %v2492_v26 }
 0x848   :  { %v1080_v18 = vmax.f32 %v1072_v1, 0.0  ;;  %v2435_v48 = vmul.f32 0.5, %v1086_v8 }
 0x849   :  { %v2363_v24 = vmax.f32 %v1075_v5, %v1079_v38  ;;  %v1087_v27 = vadd.f32 %v1079_v38, %v1075_v5  ;;  %1095 = vrot.lane.b32.xlu1 %v2359_v16, %s1652_s8  ;;  %1532 = vmatprep.mubr.msk.bf16.mxu0 %vm949_vm4, %v1531_v41 }
 0x84a   :  { %v2369_v30 = vmax.f32 %v1076_v2, %v1080_v18  ;;  %v1088_v56 = vadd.f32 %v1080_v18, %v1076_v2  ;;  %1533 = vmatprep.mubr.msk.bf16.mxu1 %vm949_vm4, %v1531_v41 }
 0x84b   :  { %2902 = vst [vmem:[#allocation14_spill] sm:$0xff] %v2363_v24  ;;  %v2371_v15 = vmul.f32 0.5, %v1087_v27  ;;  %1101 = vrot.lane.b32.xlu0 %v2363_v24, %s1652_s8 }
 0x84c   :  { %v2441_v61 = vmul.f32 0.5, %v1088_v56 }
 0x84d   :  { %2903 = vst [vmem:[#allocation15_spill] sm:$0xff] %v2371_v15  ;;  %1103 = vrot.lane.b32.xlu1 %v2371_v15, %s1652_s8 }
 0x84f   :  { %1129 = vrot.lane.b32.xlu0 %v2355_v6, %s1653_s13 }
 0x851   :  { %1131 = vrot.lane.b32.xlu1 %v2359_v16, %s1653_s13 }
 0x853   :  { %1137 = vrot.lane.b32.xlu0 %v2363_v24, %s1653_s13 }
 0x855   :  { %1139 = vrot.lane.b32.xlu1 %v2371_v15, %s1653_s13 }
 0x857   :  { %1165 = vrot.lane.b32.xlu0 %v2355_v6, %s1654_s14 }
 0x859   :  { %1167 = vrot.lane.b32.xlu1 %v2359_v16, %s1654_s14 }
 0x85b   :  { %1173 = vrot.lane.b32.xlu0 %v2363_v24, %s1654_s14 }
 0x85d   :  { %1175 = vrot.lane.b32.xlu1 %v2371_v15, %s1654_s14 }
 0x85f   :  { %1201 = vrot.lane.b32.xlu0 %v2355_v6, %s1648_s25 }
 0x861   :  { %1203 = vrot.lane.b32.xlu1 %v2359_v16, %s1648_s25 }
 0x863   :  { %1209 = vrot.lane.b32.xlu0 %v2363_v24, %s1648_s25 }
 0x865   :  { %1211 = vrot.lane.b32.xlu1 %v2371_v15, %s1648_s25 }
 0x867   :  { %1241 = vrot.lane.b32.xlu0 %v2355_v6, %s1645_s0 }
 0x869   :  { %1243 = vrot.lane.b32.xlu1 %v2359_v16, %s1645_s0 }
 0x86b   :  { %1249 = vrot.lane.b32.xlu0 %v2363_v24, %s1645_s0 }
 0x86d   :  { %1251 = vrot.lane.b32.xlu1 %v2371_v15, %s1645_s0 }
 0x86f   :  { %1277 = vrot.lane.b32.xlu0 %v2355_v6, %s1655_s15 }
 0x871   :  { %1279 = vrot.lane.b32.xlu1 %v2359_v16, %s1655_s15 }
 0x873   :  { %1285 = vrot.lane.b32.xlu0 %v2363_v24, %s1655_s15 }
 0x875   :  { %1287 = vrot.lane.b32.xlu1 %v2371_v15, %s1655_s15 }
 0x877   :  { %1313 = vrot.lane.b32.xlu0 %v2355_v6, %s1656_s16 }
 0x879   :  { %1315 = vrot.lane.b32.xlu1 %v2359_v16, %s1656_s16 }
 0x87b   :  { %1321 = vrot.lane.b32.xlu0 %v2363_v24, %s1656_s16 }
 0x87d   :  { %1323 = vrot.lane.b32.xlu1 %v2371_v15, %s1656_s16 }
 0x87f   :  { %1349 = vrot.lane.b32.xlu0 %v2355_v6, %s1657_s17 }
 0x881   :  { %1351 = vrot.lane.b32.xlu1 %v2359_v16, %s1657_s17 }
 0x883   :  { %1357 = vrot.lane.b32.xlu0 %v2363_v24, %s1657_s17 }
 0x885   :  { %1359 = vrot.lane.b32.xlu1 %v2371_v15, %s1657_s17 }
 0x887   :  { %1097 = vrot.lane.b32.xlu0 %v2357_v44, %s1652_s8 }
 0x889   :  { %1099 = vrot.lane.b32.xlu1 %v2435_v48, %s1652_s8 }
 0x88b   :  { %1105 = vrot.lane.b32.xlu0 %v2369_v30, %s1652_s8 }
 0x88d   :  { %1107 = vrot.lane.b32.xlu1 %v2441_v61, %s1652_s8 }
 0x88f   :  { %1133 = vrot.lane.b32.xlu0 %v2357_v44, %s1653_s13 }
 0x891   :  { %1135 = vrot.lane.b32.xlu1 %v2435_v48, %s1653_s13 }
 0x893   :  { %1141 = vrot.lane.b32.xlu0 %v2369_v30, %s1653_s13 }
 0x895   :  { %1143 = vrot.lane.b32.xlu1 %v2441_v61, %s1653_s13 }
 0x897   :  { %1169 = vrot.lane.b32.xlu0 %v2357_v44, %s1654_s14 }
 0x899   :  { %1171 = vrot.lane.b32.xlu1 %v2435_v48, %s1654_s14 }
 0x89b   :  { %1177 = vrot.lane.b32.xlu0 %v2369_v30, %s1654_s14 }
 0x89d   :  { %1179 = vrot.lane.b32.xlu1 %v2441_v61, %s1654_s14 }
 0x89f   :  { %1205 = vrot.lane.b32.xlu0 %v2357_v44, %s1648_s25 }
 0x8a1   :  { %1207 = vrot.lane.b32.xlu1 %v2435_v48, %s1648_s25 }
 0x8a3   :  { %1213 = vrot.lane.b32.xlu0 %v2369_v30, %s1648_s25 }
 0x8a5   :  { %1215 = vrot.lane.b32.xlu1 %v2441_v61, %s1648_s25 }
 0x8a7   :  { %1245 = vrot.lane.b32.xlu0 %v2357_v44, %s1645_s0 }
 0x8a9   :  { %1247 = vrot.lane.b32.xlu1 %v2435_v48, %s1645_s0 }
 0x8ab   :  { %1253 = vrot.lane.b32.xlu0 %v2369_v30, %s1645_s0 }
 0x8ad   :  { %1255 = vrot.lane.b32.xlu1 %v2441_v61, %s1645_s0 }
 0x8af   :  { %1281 = vrot.lane.b32.xlu0 %v2357_v44, %s1655_s15 }
 0x8b1   :  { %1283 = vrot.lane.b32.xlu1 %v2435_v48, %s1655_s15 }
 0x8b3   :  { %1289 = vrot.lane.b32.xlu0 %v2369_v30, %s1655_s15 }
 0x8b5   :  { %1291 = vrot.lane.b32.xlu1 %v2441_v61, %s1655_s15 }
 0x8b7   :  { %1317 = vrot.lane.b32.xlu0 %v2357_v44, %s1656_s16 }
 0x8b9   :  { %1319 = vrot.lane.b32.xlu1 %v2435_v48, %s1656_s16  ;;  %v1094_v36 = vpop.permute.xlu0 %1093 }
 0x8bb   :  { %v1096_v40 = vpop.permute.xlu1 %1095  ;;  %1325 = vrot.lane.b32.xlu0 %v2369_v30, %s1656_s16 }
 0x8bd   :  { %1327 = vrot.lane.b32.xlu1 %v2441_v61, %s1656_s16  ;;  %v1102_v25 = vpop.permute.xlu0 %1101 }
 0x8bf   :  { %v1104_v46 = vpop.permute.xlu1 %1103  ;;  %1353 = vrot.lane.b32.xlu0 %v2357_v44, %s1657_s17 }
 0x8c1   :  { %1355 = vrot.lane.b32.xlu1 %v2435_v48, %s1657_s17  ;;  %v2508_v22 = vpop.permute.xlu0 %1129 }
 0x8c3   :  { %v2510_v11 = vpop.permute.xlu1 %1131  ;;  %1361 = vrot.lane.b32.xlu0 %v2369_v30, %s1657_s17 }
 0x8c5   :  { %1363 = vrot.lane.b32.xlu1 %v2441_v61, %s1657_s17  ;;  %v2519_v49 = vpop.permute.xlu0 %1137 }
 0x8c7   :  { %v2521_v60 = vpop.permute.xlu1 %1139  ;;  %1478 = vperm.xlu0 %1555, %v509_v47  }
 0x8c9   :  { %1486 = vperm.xlu1 %1556, %v509_v47   ;;  %v2523_v4 = vpop.permute.xlu0 %1165 }
 0x8cb   :  { %v2525_v8 = vpop.permute.xlu1 %1167  ;;  %1557 = vset.pattern.permute.xlu0 %v1658_v35 }
 0x8cd   :  { %v2528_v1 = vpop.permute.xlu0 %1173 }
 0x8cf   :  { %v2530_v5 = vpop.permute.xlu1 %1175 }
 0x8d1   :  { %v2532_v38 = vpop.permute.xlu0 %1201 }
 0x8d3   :  { %v2534_v2 = vpop.permute.xlu1 %1203 }
 0x8d5   :  { %v2536_v18 = vpop.permute.xlu0 %1209 }
 0x8d7   :  { %v2538_v27 = vpop.permute.xlu1 %1211 }
 0x8d9   :  { %v2540_v56 = vpop.permute.xlu0 %1241 }
 0x8db   :  { %v2542_v41 = vpop.permute.xlu1 %1243 }
 0x8dd   :  { %v2544_v47 = vpop.permute.xlu0 %1249 }
 0x8df   :  { %v2546_v31 = vpop.permute.xlu1 %1251 }
 0x8e1   :  { %v2548_v35 = vpop.permute.xlu0 %1277 }
 0x8e3   :  { %v2550_v58 = vpop.permute.xlu1 %1279 }
 0x8e4   :  { %2905 = vst [vmem:[#allocation17_spill] sm:$0xff] %v2550_v58 }
 0x8e5   :  { %v2552_v50 = vpop.permute.xlu0 %1285 }
 0x8e7   :  { %v2554_v32 = vpop.permute.xlu1 %1287 }
 0x8e8   :  { %2906 = vst [vmem:[#allocation18_spill] sm:$0xff] %v2554_v32 }
 0x8e9   :  { %v2556_v26 = vpop.permute.xlu0 %1313 }
 0x8ea   :  { %2907 = vst [vmem:[#allocation19_spill] sm:$0xff] %v2556_v26 }
 0x8eb   :  { %v2558_v62 = vpop.permute.xlu1 %1315 }
 0x8ec   :  { %2908 = vst [vmem:[#allocation20_spill] sm:$0xff] %v2558_v62 }
 0x8ed   :  { %v2560_v9 = vpop.permute.xlu0 %1321 }
 0x8ee   :  { %2909 = vst [vmem:[#allocation21_spill] sm:$0xff] %v2560_v9 }
 0x8ef   :  { %v2562_v54 = vpop.permute.xlu1 %1323 }
 0x8f0   :  { %2910 = vst [vmem:[#allocation22_spill] sm:$0xff] %v2562_v54 }
 0x8f1   :  { %v2564_v21 = vpop.permute.xlu0 %1349 }
 0x8f2   :  { %2911 = vst [vmem:[#allocation23_spill] sm:$0xff] %v2564_v21 }
 0x8f3   :  { %v2566_v59 = vpop.permute.xlu1 %1351 }
 0x8f4   :  { %2912 = vst [vmem:[#allocation24_spill] sm:$0xff] %v2566_v59 }
 0x8f5   :  { %v2568_v17 = vpop.permute.xlu0 %1357 }
 0x8f6   :  { %2913 = vst [vmem:[#allocation25_spill] sm:$0xff] %v2568_v17 }
 0x8f7   :  { %v2570_v55 = vpop.permute.xlu1 %1359 }
 0x8f8   :  { %2914 = vst [vmem:[#allocation26_spill] sm:$0xff] %v2570_v55 }
 0x8f9   :  { %v1098_v34 = vpop.permute.xlu0 %1097 }
 0x8fa   :  { %v1111_v19 = vsel %vm528_vm3, %v1098_v34, %v1102_v25  ;;  %v1113_v26 = vsel %vm528_vm3, %v1094_v36, %v1098_v34 }
 0x8fb   :  { %v1100_v62 = vpop.permute.xlu1 %1099  ;;  %v1118_v59 = vmul.f32 %v1113_v26, %v1992_v57  ;;  %v1119_v17 = vmul.f32 %v1111_v19, %v2053_v33 }
 0x8fc   :  { %v1112_v9 = vsel %vm528_vm3, %v1100_v62, %v1104_v46  ;;  %v1114_v21 = vsel %vm528_vm3, %v1096_v40, %v1100_v62 }
 0x8fd   :  { %v1122_v55 = vmul.f32 %v1114_v21, %v1992_v57  ;;  %v1123_v54 = vmul.f32 %v1112_v9, %v2053_v33  ;;  %v1106_v58 = vpop.permute.xlu0 %1105 }
 0x8fe   :  { %v1109_v32 = vsel %vm528_vm3, %v1102_v25, %v1106_v58  ;;  %v1115_v34 = vsel %vm528_vm3, %v1106_v58, %v1094_v36 }
 0x8ff   :  { %v1127_v23 = vpack.c.bf16 %v1123_v54, %v1119_v17  ;;  %v1108_v24 = vpop.permute.xlu1 %1107  ;;  %v1126_v15 = vpack.c.bf16 %v1122_v55, %v1118_v59  ;;  %v1117_v57 = vmul.f32 %v1115_v34, %v2041_v28  ;;  %v1120_v33 = vmul.f32 %v1109_v32, %v2045_v29 }
 0x900   :  { %v1110_v62 = vsel %vm528_vm3, %v1104_v46, %v1108_v24  ;;  %v1116_v19 = vsel %vm528_vm3, %v1108_v24, %v1096_v40 }
 0x901   :  { %v1121_v21 = vmul.f32 %v1116_v19, %v2041_v28  ;;  %v1124_v9 = vmul.f32 %v1110_v62, %v2045_v29  ;;  %1394 = vmatprep.subr.bf16.mxu0 %v1126_v15  ;;  %v1134_v26 = vpop.permute.xlu0 %1133 }
 0x902   :  { %v1147_v55 = vsel %vm581_vm5, %v1134_v26, %v2519_v49  ;;  %v1149_v59 = vsel %vm581_vm5, %v2508_v22, %v1134_v26 }
 0x903   :  { %v1125_v17 = vpack.c.bf16 %v1121_v21, %v1117_v57  ;;  %v1136_v54 = vpop.permute.xlu1 %1135  ;;  %v1128_v24 = vpack.c.bf16 %v1124_v9, %v1120_v33  ;;  %v1154_v58 = vmul.f32 %v1149_v59, %v2074_v51  ;;  %v1155_v32 = vmul.f32 %v1147_v55, %v2091_v7 }
 0x904   :  { %v1148_v28 = vsel %vm581_vm5, %v1136_v54, %v2521_v60  ;;  %v1150_v29 = vsel %vm581_vm5, %v2510_v11, %v1136_v54 }
 0x905   :  { %v1158_v15 = vmul.f32 %v1150_v29, %v2074_v51  ;;  %v1159_v36 = vmul.f32 %v1148_v28, %v2091_v7  ;;  %1395 = vmatpush1.bf16.msra.mxu0 %v1125_v17  ;;  %1435 = vmatprep.subr.bf16.mxu1 %v1128_v24  ;;  %v1142_v40 = vpop.permute.xlu0 %1141 }
 0x906   :  { %v1145_v25 = vsel %vm581_vm5, %v2519_v49, %v1142_v40  ;;  %v1151_v46 = vsel %vm581_vm5, %v1142_v40, %v2508_v22  ;;  %1436 = vmatpush1.bf16.msra.mxu1 %v1127_v23 }
 0x907   :  { %v1163_v34 = vpack.c.bf16 %v1159_v36, %v1155_v32  ;;  %v1144_v62 = vpop.permute.xlu1 %1143  ;;  %v1162_v19 = vpack.c.bf16 %v1158_v15, %v1154_v58  ;;  %v1153_v57 = vmul.f32 %v1151_v46, %v2085_v63  ;;  %v1156_v49 = vmul.f32 %v1145_v25, %v2088_v0 }
 0x908   :  { %v1146_v51 = vsel %vm581_vm5, %v2521_v60, %v1144_v62  ;;  %v1152_v7 = vsel %vm581_vm5, %v1144_v62, %v2510_v11 }
 0x909   :  { %v1157_v33 = vmul.f32 %v1152_v7, %v2085_v63  ;;  %v1160_v22 = vmul.f32 %v1146_v51, %v2088_v0  ;;  %1396 = vmatprep.subr.bf16.mxu0 %v1162_v19  ;;  %v1170_v23 = vpop.permute.xlu0 %1169 }
 0x90a   :  { %v1183_v21 = vsel %vm634_vm6, %v1170_v23, %v2528_v1  ;;  %v1185_v60 = vsel %vm634_vm6, %v2523_v4, %v1170_v23 }
 0x90b   :  { %v1161_v9 = vpack.c.bf16 %v1157_v33, %v1153_v57  ;;  %v1172_v11 = vpop.permute.xlu1 %1171  ;;  %v1164_v26 = vpack.c.bf16 %v1160_v22, %v1156_v49  ;;  %v1190_v55 = vmul.f32 %v1185_v60, %v2112_v39  ;;  %v1191_v59 = vmul.f32 %v1183_v21, %v2129_v53 }
 0x90c   :  { %v1184_v63 = vsel %vm634_vm6, %v1172_v11, %v2530_v5  ;;  %v1186_v0 = vsel %vm634_vm6, %v2525_v8, %v1172_v11 }
 0x90d   :  { %v1194_v17 = vmul.f32 %v1186_v0, %v2112_v39  ;;  %v1195_v54 = vmul.f32 %v1184_v63, %v2129_v53  ;;  %1397 = vmatpush1.bf16.msra.mxu0 %v1161_v9  ;;  %1437 = vmatprep.subr.bf16.mxu1 %v1164_v26  ;;  %v1178_v24 = vpop.permute.xlu0 %1177 }
 0x90e   :  { %v1181_v58 = vsel %vm634_vm6, %v2528_v1, %v1178_v24  ;;  %v1187_v28 = vsel %vm634_vm6, %v1178_v24, %v2523_v4  ;;  %1438 = vmatpush1.bf16.msra.mxu1 %v1163_v34 }
 0x90f   :  { %v1199_v29 = vpack.c.bf16 %v1195_v54, %v1191_v59  ;;  %v1180_v32 = vpop.permute.xlu1 %1179  ;;  %v1198_v15 = vpack.c.bf16 %v1194_v17, %v1190_v55  ;;  %v1189_v36 = vmul.f32 %v1187_v28, %v2123_v12  ;;  %v1192_v1 = vmul.f32 %v1181_v58, %v2126_v52 }
 0x910   :  { %v1182_v39 = vsel %vm634_vm6, %v2530_v5, %v1180_v32  ;;  %v1188_v53 = vsel %vm634_vm6, %v1180_v32, %v2525_v8 }
 0x911   :  { %v1193_v40 = vmul.f32 %v1188_v53, %v2123_v12  ;;  %v1196_v4 = vmul.f32 %v1182_v39, %v2126_v52  ;;  %1398 = vmatprep.subr.bf16.mxu0 %v1198_v15  ;;  %v1206_v25 = vpop.permute.xlu0 %1205 }
 0x912   :  { %v1219_v46 = vsel %vm687_vm7, %v1206_v25, %v2536_v18  ;;  %v1221_v5 = vsel %vm687_vm7, %v2532_v38, %v1206_v25 }
 0x913   :  { %v1197_v34 = vpack.c.bf16 %v1193_v40, %v1189_v36  ;;  %v1208_v8 = vpop.permute.xlu1 %1207  ;;  %v1200_v62 = vpack.c.bf16 %v1196_v4, %v1192_v1  ;;  %v1226_v19 = vmul.f32 %v1221_v5, %v2150_v20  ;;  %v1227_v51 = vmul.f32 %v1219_v46, %v2167_v45  ;;  %v2916_v36 = vld [vmem:[#allocation15_spill] sm:$0xff]  ;;  %v2917_v1 = vld [vmem:[#allocation14_spill] sm:$0xff] }
 0x914   :  { %v1220_v12 = vsel %vm687_vm7, %v1208_v8, %v2538_v27  ;;  %v1222_v52 = vsel %vm687_vm7, %v2534_v2, %v1208_v8  ;;  %v2918_v40 = vpack.c.bf16 %v2916_v36, %v2917_v1  ;;  %v2919_v46 = vld [vmem:[#allocation3_spill] sm:$0xff]  ;;  %v2933_v1 = vld [vmem:[#allocation25_spill] sm:$0xff] }
 0x915   :  { %v1230_v7 = vmul.f32 %v1222_v52, %v2150_v20  ;;  %v1231_v57 = vmul.f32 %v1220_v12, %v2167_v45  ;;  %1399 = vmatpush1.bf16.msra.mxu0 %v1197_v34  ;;  %1439 = vmatprep.subr.bf16.mxu1 %v1200_v62  ;;  %v1214_v49 = vpop.permute.xlu0 %1213  ;;  %v2921_v34 = vld [vmem:[#allocation17_spill] sm:$0xff]  ;;  %v2922_v62 = vld [vmem:[#allocation2_spill] sm:$0xff] }
 0x916   :  { %v1217_v33 = vsel %vm687_vm7, %v2536_v18, %v1214_v49  ;;  %v1223_v22 = vsel %vm687_vm7, %v1214_v49, %v2532_v38  ;;  %1440 = vmatpush1.bf16.msra.mxu1 %v1199_v29 }
 0x917   :  { %v1235_v23 = vpack.c.bf16 %v1231_v57, %v1227_v51  ;;  %v1216_v21 = vpop.permute.xlu1 %1215  ;;  %v1234_v60 = vpack.c.bf16 %v1230_v7, %v1226_v19  ;;  %v1225_v9 = vmul.f32 %v1223_v22, %v2161_v42  ;;  %v1228_v18 = vmul.f32 %v1217_v33, %v2164_v43 }
 0x918   :  { %v1218_v20 = vsel %vm687_vm7, %v2538_v27, %v1216_v21  ;;  %v1224_v45 = vsel %vm687_vm7, %v1216_v21, %v2534_v2 }
 0x919   :  { %v1229_v11 = vmul.f32 %v1224_v45, %v2161_v42  ;;  %v1232_v38 = vmul.f32 %v1218_v20, %v2164_v43  ;;  %1400 = vmatprep.subr.bf16.mxu0 %v1234_v60  ;;  %v1246_v26 = vpop.permute.xlu0 %1245  ;;  %v1238_v42 = vpack.c.bf16 %v2435_v48, %v2357_v44  ;;  %v1240_v43 = vpack.c.bf16 %v2441_v61, %v2369_v30  ;;  %v2923_v60 = vld [vmem:[#allocation4_spill] sm:$0xff]  ;;  %v2924_v45 = vld [vmem:[#allocation5_spill] sm:$0xff] }
 0x91a   :  { %v1259_v55 = vsel %vm744_vm8, %v1246_v26, %v2544_v47  ;;  %v1261_v17 = vsel %vm744_vm8, %v2540_v56, %v1246_v26  ;;  %v2926_v26 = vld [vmem:[#allocation19_spill] sm:$0xff] }
 0x91b   :  { %v1233_v63 = vpack.c.bf16 %v1229_v11, %v1225_v9  ;;  %v1248_v27 = vpop.permute.xlu1 %1247  ;;  %v1236_v0 = vpack.c.bf16 %v1232_v38, %v1228_v18  ;;  %v1266_v54 = vmul.f32 %v1259_v55, %v2198_v13  ;;  %v2925_v11 = vld [vmem:[#allocation21_spill] sm:$0xff] }
 0x91c   :  { %v1260_v2 = vsel %vm744_vm8, %v1248_v27, %v2546_v31  ;;  %v1262_v59 = vsel %vm744_vm8, %v2542_v41, %v1248_v27 }
 0x91d   :  { %v1270_v24 = vmul.f32 %v1260_v2, %v2198_v13  ;;  %1401 = vmatpush1.bf16.msra.mxu0 %v1233_v63  ;;  %1441 = vmatprep.subr.bf16.mxu1 %v1236_v0  ;;  %v1254_v58 = vpop.permute.xlu0 %1253  ;;  %v1269_v30 = vmul.f32 %v1262_v59, %v2201_v14  ;;  %v1265_v13 = vmul.f32 %v1261_v17, %v2201_v14  ;;  %v2927_v2 = vld [vmem:[#allocation22_spill] sm:$0xff]  ;;  %v2929_v17 = vld [vmem:[#allocation7_spill] sm:$0xff] }
 0x91e   :  { %v1257_v28 = vsel %vm744_vm8, %v2544_v47, %v1254_v58  ;;  %v1263_v44 = vsel %vm744_vm8, %v1254_v58, %v2540_v56  ;;  %1402 = vmatprep.subr.bf16.mxu0 %v1238_v42  ;;  %1442 = vmatpush1.bf16.msra.mxu1 %v1235_v23  ;;  %v2915_v14 = vpack.c.bf16 %v2359_v16, %v2355_v6  ;;  %v2920_v16 = vld [vmem:[#allocation18_spill] sm:$0xff]  ;;  %v2928_v42 = vld [vmem:[#allocation20_spill] sm:$0xff] }
 0x91f   :  { %v1256_v48 = vpop.permute.xlu1 %1255  ;;  %1443 = vmatprep.subr.bf16.mxu1 %v1240_v43  ;;  %v1274_v61 = vpack.c.bf16 %v1270_v24, %v1266_v54  ;;  %v1267_v32 = vmul.f32 %v1257_v28, %v2213_v37  ;;  %v1268_v56 = vmul.f32 %v1263_v44, %v2216_v10  ;;  %v2930_v24 = vld [vmem:[#allocation6_spill] sm:$0xff] }
 0x920   :  { %v1258_v29 = vsel %vm744_vm8, %v2546_v31, %v1256_v48  ;;  %v1264_v47 = vsel %vm744_vm8, %v1256_v48, %v2542_v41 }
 0x921   :  { %v1271_v15 = vmul.f32 %v1258_v29, %v2213_v37  ;;  %v1272_v39 = vmul.f32 %v1264_v47, %v2216_v10  ;;  %v1282_v53 = vpop.permute.xlu0 %1281  ;;  %1403 = vmatpush1.bf16.msra.mxu0 %v2915_v14  ;;  %v1273_v37 = vpack.c.bf16 %v1269_v30, %v1265_v13 }
 0x922   :  { %v1295_v31 = vsel %vm797_vm9, %v1282_v53, %v2552_v50  ;;  %v1297_v41 = vsel %vm797_vm9, %v2548_v35, %v1282_v53  ;;  %1404 = vmatprep.subr.bf16.mxu0 %v1274_v61  ;;  %1444 = vmatpush1.bf16.msra.mxu1 %v2918_v40  ;;  %v2932_v53 = vld [vmem:[#allocation9_spill] sm:$0xff] }
 0x923   :  { %v1275_v10 = vpack.c.bf16 %v1271_v15, %v1267_v32  ;;  %v1284_v4 = vpop.permute.xlu1 %1283  ;;  %v1276_v25 = vpack.c.bf16 %v1272_v39, %v1268_v56  ;;  %v1301_v6 = vmul.f32 %v1297_v41, %v2919_v46  ;;  %v1302_v19 = vmul.f32 %v1295_v31, %v2922_v62  ;;  %v2931_v15 = vld [vmem:[#allocation8_spill] sm:$0xff] }
 0x924   :  { %v1296_v5 = vsel %vm797_vm9, %v1284_v4, %v2920_v16  ;;  %v1298_v8 = vsel %vm797_vm9, %v2921_v34, %v1284_v4 }
 0x925   :  { %v1305_v12 = vmul.f32 %v1298_v8, %v2919_v46  ;;  %v1306_v52 = vmul.f32 %v1296_v5, %v2922_v62  ;;  %1445 = vmatprep.subr.bf16.mxu1 %v1276_v25  ;;  %v1290_v51 = vpop.permute.xlu0 %1289  ;;  %1405 = vmatpush1.bf16.msra.mxu0 %v1273_v37  ;;  %v2934_v37 = vld [vmem:[#allocation23_spill] sm:$0xff]  ;;  %v2936_v5 = vld [vmem:[#allocation24_spill] sm:$0xff] }
 0x926   :  { %v1293_v7 = vsel %vm797_vm9, %v2552_v50, %v1290_v51  ;;  %v1299_v57 = vsel %vm797_vm9, %v1290_v51, %v2548_v35  ;;  %1446 = vmatpush1.bf16.msra.mxu1 %v1275_v10  ;;  %v2937_v8 = vld [vmem:[#allocation11_spill] sm:$0xff] }
 0x927   :  { %v1309_v49 = vpack.c.bf16 %v1305_v12, %v1301_v6  ;;  %v1292_v33 = vpop.permute.xlu1 %1291  ;;  %v1310_v22 = vpack.c.bf16 %v1306_v52, %v1302_v19  ;;  %v1303_v20 = vmul.f32 %v1293_v7, %v2923_v60  ;;  %v1304_v50 = vmul.f32 %v1299_v57, %v2924_v45  ;;  %v2935_v6 = vld [vmem:[#allocation26_spill] sm:$0xff] }
 0x928   :  { %v1294_v23 = vsel %vm797_vm9, %v2920_v16, %v1292_v33  ;;  %v1300_v21 = vsel %vm797_vm9, %v1292_v33, %v2921_v34  ;;  %v2938_v19 = vld [vmem:[#allocation10_spill] sm:$0xff] }
 0x929   :  { %v1307_v9 = vmul.f32 %v1294_v23, %v2923_v60  ;;  %v1308_v35 = vmul.f32 %v1300_v21, %v2924_v45  ;;  %v1318_v18 = vpop.permute.xlu0 %1317  ;;  %1406 = vmatprep.subr.bf16.mxu0 %v1310_v22 }
 0x92a   :  { %v1331_v38 = vsel %vm850_vm10, %v1318_v18, %v2925_v11  ;;  %v1333_v55 = vsel %vm850_vm10, %v2926_v26, %v1318_v18  ;;  %1407 = vmatpush1.bf16.msra.mxu0 %v1309_v49 }
 0x92b   :  { %v1311_v63 = vpack.c.bf16 %v1307_v9, %v1303_v20  ;;  %v1320_v27 = vpop.permute.xlu1 %1319  ;;  %v1312_v0 = vpack.c.bf16 %v1308_v35, %v1304_v50  ;;  %v1337_v54 = vmul.f32 %v1333_v55, %v2929_v17  ;;  %v1338_v58 = vmul.f32 %v1331_v38, %v2930_v24  ;;  %v2939_v20 = vld [vmem:[#allocation16_spill] sm:$0xff]  ;;  %v2941_v35 = vld [vmem:[#allocation13_spill] sm:$0xff] }
 0x92c   :  { %v1332_v59 = vsel %vm850_vm10, %v1320_v27, %v2927_v2  ;;  %v1334_v43 = vsel %vm850_vm10, %v2928_v42, %v1320_v27  ;;  %v1530_v45 = vcombine.low %v2939_v20, %v2939_v20  ;;  %v2940_v50 = vld [vmem:[#allocation12_spill] sm:$0xff] }
 0x92d   :  { %v1341_v28 = vmul.f32 %v1334_v43, %v2929_v17  ;;  %v1342_v44 = vmul.f32 %v1332_v59, %v2930_v24  ;;  %1447 = vmatprep.subr.bf16.mxu1 %v1312_v0  ;;  %v1326_v30 = vpop.permute.xlu0 %1325 }
 0x92e   :  { %v1329_v48 = vsel %vm850_vm10, %v2925_v11, %v1326_v30  ;;  %v1335_v61 = vsel %vm850_vm10, %v1326_v30, %v2926_v26  ;;  %1448 = vmatpush1.bf16.msra.mxu1 %v1311_v63 }
 0x92f   :  { %v1345_v13 = vpack.c.bf16 %v1341_v28, %v1337_v54  ;;  %v1328_v29 = vpop.permute.xlu1 %1327  ;;  %v1346_v47 = vpack.c.bf16 %v1342_v44, %v1338_v58  ;;  %v1339_v39 = vmul.f32 %v1329_v48, %v2931_v15  ;;  %v1340_v14 = vmul.f32 %v1335_v61, %v2932_v53 }
 0x930   :  { %v1330_v32 = vsel %vm850_vm10, %v2927_v2, %v1328_v29  ;;  %v1336_v56 = vsel %vm850_vm10, %v1328_v29, %v2928_v42 }
 0x931   :  { %v1343_v31 = vmul.f32 %v1330_v32, %v2931_v15  ;;  %v1344_v41 = vmul.f32 %v1336_v56, %v2932_v53  ;;  %v1354_v36 = vpop.permute.xlu0 %1353  ;;  %1408 = vmatprep.subr.bf16.mxu0 %v1346_v47 }
 0x932   :  { %v1367_v40 = vsel %vm903_vm11, %v1354_v36, %v2933_v1  ;;  %v1369_v10 = vsel %vm903_vm11, %v2934_v37, %v1354_v36  ;;  %1409 = vmatpush1.bf16.msra.mxu0 %v1345_v13 }
 0x933   :  { %v1347_v4 = vpack.c.bf16 %v1343_v31, %v1339_v39  ;;  %v1356_v25 = vpop.permute.xlu1 %1355  ;;  %v1348_v46 = vpack.c.bf16 %v1344_v41, %v1340_v14  ;;  %v1373_v62 = vmul.f32 %v2937_v8, %v1369_v10  ;;  %v1374_v12 = vmul.f32 %v2938_v19, %v1367_v40 }
 0x934   :  { %v1368_v16 = vsel %vm903_vm11, %v1356_v25, %v2935_v6  ;;  %v1370_v34 = vsel %vm903_vm11, %v2936_v5, %v1356_v25 }
 0x935   :  { %v1377_v52 = vmul.f32 %v2937_v8, %v1370_v34  ;;  %v1378_v51 = vmul.f32 %v2938_v19, %v1368_v16  ;;  %1449 = vmatprep.subr.bf16.mxu1 %v1348_v46  ;;  %v1362_v7 = vpop.permute.xlu0 %1361 }
 0x936   :  { %v1365_v57 = vsel %vm903_vm11, %v2933_v1, %v1362_v7  ;;  %v1371_v49 = vsel %vm903_vm11, %v1362_v7, %v2934_v37  ;;  %1450 = vmatpush1.bf16.msra.mxu1 %v1347_v4 }
 0x937   :  { %v1381_v33 = vpack.c.bf16 %v1377_v52, %v1373_v62  ;;  %v1364_v22 = vpop.permute.xlu1 %1363  ;;  %v1382_v23 = vpack.c.bf16 %v1378_v51, %v1374_v12  ;;  %v1375_v9 = vmul.f32 %v2940_v50, %v1365_v57  ;;  %v1376_v18 = vmul.f32 %v2941_v35, %v1371_v49 }
 0x938   :  { %v1366_v21 = vsel %vm903_vm11, %v2935_v6, %v1364_v22  ;;  %v1372_v60 = vsel %vm903_vm11, %v1364_v22, %v2936_v5 }
 0x939   :  { %v1379_v11 = vmul.f32 %v2940_v50, %v1366_v21  ;;  %v1380_v38 = vmul.f32 %v2941_v35, %v1372_v60  ;;  %1410 = vmatprep.subr.bf16.mxu0 %v1382_v23 }
 0x93a   :  { %1411 = vmatpush1.bf16.msra.mxu0 %v1381_v33 }
 0x93b   :  { %v1383_v26 = vpack.c.bf16 %v1379_v11, %v1375_v9  ;;  %v1384_v55 = vpack.c.bf16 %v1380_v38, %v1376_v18 }
 0x93d   :  { %1427 = vmatmul.mubr.bf16.vlgmr.msra.gmra.mrb[4].mxu0 %v1530_v45  ;;  %1451 = vmatprep.subr.bf16.mxu1 %v1384_v55 }
 0x93e   :  { %1452 = vmatpush1.bf16.msra.mxu1 %v1383_v26 }
 0x941   :  { %1468 = vmatmul.mubr.bf16.vlgmr.msra.gmra.mrb[4].mxu1 %v1530_v45 }
 0x946   :  { %v1479_v3 = vpop.permute.xlu0 %1478 }
 0x948   :  { %v1487_v2 = vpop.permute.xlu1 %1486 }
 0xa10   :  { %v1428_v63 = vpop.f32.mrb[4].mxu0 }
 0xa11   :  { %v1481_v27 = vmul.f32 %v1479_v3, %v1428_v63  ;;  %v1430_v0 = vpop.f32.mrb[5].mxu0 }
 0xa12   :  { %v1482_v59 = vmul.f32 %v1479_v3, %v1430_v0  ;;  %v1432_v42 = vpop.f32.mrb[6].mxu0 }
 0xa13   :  { %v1489_v43 = vadd.f32 %v1487_v2, %v1481_v27  ;;  %v1433_v17 = vpop.f32.mrb[7].mxu0 }
 0xa14   :  { %v1490_v54 = vadd.f32 %v1487_v2, %v1482_v59  ;;  %v1469_v24 = vpop.f32.mrb[4].mxu1 }
 0xa15   :  { %v1493_v58 = vmax.f32 %v1489_v43, 0.0  ;;  %v1483_v28 = vmul.f32 %v1479_v3, %v1469_v24  ;;  %v1471_v44 = vpop.f32.mrb[5].mxu1 }
 0xa16   :  { %v1494_v30 = vmax.f32 %v1490_v54, 0.0  ;;  %v1484_v48 = vmul.f32 %v1479_v3, %v1471_v44  ;;  %v1473_v61 = vpop.f32.mrb[6].mxu1 }
 0xa17   :  { %1497 = vst [vmem:[%s2852_s7] sm:$0xff] %v1493_v58  ;;  %v1491_v13 = vadd.f32 %v1487_v2, %v1483_v28  ;;  %v1474_v29 = vpop.f32.mrb[7].mxu1 }
 0xa18   :  { %1498 = vst [vmem:[%s2852_s7 + $0x8] sm:$0xff] %v1494_v30  ;;  %v1492_v47 = vadd.f32 %v1487_v2, %v1484_v48 }
 0xa19   :  { %v1495_v32 = vmax.f32 %v1491_v13, 0.0 }
 0xa1a   :  { %v1496_v56 = vmax.f32 %v1492_v47, 0.0 }
 0xa1b   :  { %1534 = vst [vmem:[%s2852_s7 + $0x10] sm:$0xff] %v1495_v32 }
 0xa1c   :  { %1535 = vst [vmem:[%s2852_s7 + $0x18] sm:$0xff] %v1496_v56 }

</bundles_post_ra>
